<compile_context>
chip_gen: v7x
topology: tpu7x:2x2x1
jax: 0.10.0
libtpu: 0.0.40
codegen_flags: <defaults>
</compile_context>

<pallas_src>
import jax
import jax.numpy as jnp
from jax import lax
from jax.experimental import pallas as pl
from jax.experimental.pallas import tpu as pltpu


def _make_dtw_kernel(Tb, Bb, Dp, ML, L, Dc, num_chunks, nb):
    """Builds the kernel body with all static sizes closed over."""

    def kernel(x_ref, u_ref, ub_ref, proto_ref, h0_ref, s_ref, state_ref, dma_sem):
        bi = pl.program_id(0)   # batch block (parallel)
        ti = pl.program_id(1)   # time block  (arbitrary / sequential)

        # Load the initial hidden state from HBM into the VMEM state scratch
        # once per batch block (hidden is not kept resident across the grid).
        @pl.when(ti == 0)
        def _():
            if nb == 1:
                src = h0_ref
            else:
                src = h0_ref.at[pl.ds(pl.multiple_of(bi * Bb, Bb), Bb), :]
            cp = pltpu.make_async_copy(src, state_ref, dma_sem)
            cp.start()
            cp.wait()

        # Hoisted per-grid-step constants (lane vectors / masks).
        u_b = u_ref[...].reshape(1, 1, ML)        # (1, 1, M*L)
        ub_b = ub_ref[...].reshape(1, 1, ML)      # (1, 1, M*L)
        lane = lax.broadcasted_iota(jnp.int32, (1, ML), 1)
        group_start = (lane % L) == 0             # start-of-prototype mask

        def l1_dist(x):                           # x: (Bb, Dp)
            if num_chunks == 1:
                xt = x[:, :, None] * u_b + ub_b                    # (Bb, Dp, ML)
                return jnp.sum(jnp.abs(proto_ref[...][None] - xt), axis=1)

            def chunk(k, dist):
                d0 = pl.multiple_of(k * Dc, Dc)
                x_c = x[:, pl.ds(d0, Dc)]                          # (Bb, Dc)
                p_c = proto_ref[pl.ds(d0, Dc), :]                  # (Dc, ML)
                xt = x_c[:, :, None] * u_b + ub_b                  # (Bb, Dc, ML)
                return dist + jnp.sum(jnp.abs(p_c[None] - xt), axis=1)

            return lax.fori_loop(0, num_chunks, chunk,
                                 jnp.zeros((Bb, ML), jnp.float32),
                                 unroll=(num_chunks <= 4))

        def timestep(t, state):                   # state: (Bb, M*L)
            x = x_ref[t]                          # (Bb, Dp)
            dist = l1_dist(x)
            # ConstantPad1d((1,0), +inf) + min-pool(k=2, s=1) over the flat
            # lane axis: roll one lane, re-inject +inf at each group start.
            shifted = pltpu.roll(state, shift=1, axis=1)
            shifted = jnp.where(group_start, jnp.inf, shifted)
            s_t = dist + jnp.minimum(state, shifted)
            s_ref[t] = s_t
            return s_t

        state_ref[...] = lax.fori_loop(
            0, Tb, timestep, state_ref[...],
            unroll=(Tb <= 8 and num_chunks == 1))

    return kernel


def dtw_rnn_forward(inputs_seq, hidden, u, u_bias, prototypes, *,
                    t_block=8, d_chunk=64):
    """Runs T steps of the DTW_RNN recurrence in one pallas_call.

    inputs_seq: (T, B, D), hidden: (B, M, L), u/u_bias: (1, M),
    prototypes: (M, L, D).  Returns (o_all (T, B, M), s_all (T, B, M, L)).
    """
    T, B, D = inputs_seq.shape
    M, L, D2 = prototypes.shape
    assert D == D2 and hidden.shape == (B, M, L)
    ML = M * L

    # Lane-flat parameters: flat index ml = m*L + l.
    u_lane = jnp.repeat(u.reshape(M).astype(jnp.float32), L).reshape(1, ML)
    ub_lane = jnp.repeat(u_bias.reshape(M).astype(jnp.float32), L).reshape(1, ML)

    # Prototypes (M, L, D) -> (D, M*L): D on sublanes (reduction), M*L lane-dense.
    protoF = jnp.transpose(prototypes.astype(jnp.float32), (2, 0, 1)).reshape(D, ML)

    # D chunking; pad D to a multiple of the chunk.  Padded prototype rows equal
    # u_bias so |p - (0*u + ub)| == 0 and the padding is distance-neutral.
    Dc = min(d_chunk, ((D + 7) // 8) * 8)
    Dp = ((D + Dc - 1) // Dc) * Dc
    num_chunks = Dp // Dc
    if Dp != D:
        protoF = jnp.concatenate(
            [protoF, jnp.broadcast_to(ub_lane, (Dp - D, ML))], axis=0)

    # Batch blocking: 2 "parallel" blocks when large enough (v7x megacore).
    nb = 2 if (B >= 16 and B % 16 == 0) else 1
    Bb = B // nb

    # Timestep batching: Tb recurrence steps per grid iteration.
    Tb = min(t_block, T)
    nt = -(-T // Tb)
    Tp = nt * Tb

    x = inputs_seq.astype(jnp.float32)
    if Tp != T or Dp != D:
        x = jnp.pad(x, ((0, Tp - T), (0, 0), (0, Dp - D)))

    h_flat = hidden.reshape(B, ML).astype(jnp.float32)

    kernel = _make_dtw_kernel(Tb, Bb, Dp, ML, L, Dc, num_chunks, nb)

    s_flat = pl.pallas_call(
        kernel,
        out_shape=jax.ShapeDtypeStruct((Tp, B, ML), jnp.float32),
        grid_spec=pltpu.PrefetchScalarGridSpec(
            num_scalar_prefetch=0,
            grid=(nb, nt),
            in_specs=[
                pl.BlockSpec((Tb, Bb, Dp), lambda b, t: (t, b, 0)),   # inputs
                pl.BlockSpec((1, ML), lambda b, t: (0, 0)),           # u        (resident)
                pl.BlockSpec((1, ML), lambda b, t: (0, 0)),           # u_bias   (resident)
                pl.BlockSpec((Dp, ML), lambda b, t: (0, 0)),          # protoF   (resident)
                pl.BlockSpec(memory_space=pl.ANY),                    # hidden stays in HBM
            ],
            out_specs=pl.BlockSpec((Tb, Bb, ML), lambda b, t: (t, b, 0)),
            scratch_shapes=[
                pltpu.VMEM((Bb, ML), jnp.float32),    # recurrent state carry
                pltpu.SemaphoreType.DMA(()),          # h0 -> state DMA
            ],
        ),
        compiler_params=pltpu.CompilerParams(
            dimension_semantics=("parallel", "arbitrary"),
            vmem_limit_bytes=64 * 1024 * 1024,
        ),
    )(x, u_lane, ub_lane, protoF, h_flat)

    s_all = s_flat[:T].reshape(T, B, M, L)
    # o = one-hot at the last position => matmul(s_t, o) == s_t[..., L-1].
    # (The literal torch.matmul turns rows still holding +inf into NaN via
    # inf*0 during warm-up; that artifact is intentionally not reproduced.)
    o_all = s_all[..., L - 1]
    return o_all, s_all


def dtw_rnn_reference(inputs_seq, hidden, u, u_bias, prototypes):
    """Pure-JAX step-by-step reference mirroring the PyTorch module exactly."""
    T, B, D = inputs_seq.shape
    M, L, _ = prototypes.shape
    o_hot = jnp.zeros((L,), jnp.float32).at[-1].set(1.0)
    h = hidden
    o_list, s_list = [], []
    for t in range(T):
        x = inputs_seq[t]
        xt = x[:, None, :] * u[0][None, :, None] + u_bias[0][None, :, None]      # (B, M, D)
        dist = jnp.sum(jnp.abs(prototypes[None] - xt[:, :, None, :] + 1e-16), -1)
        padded = jnp.concatenate(
            [jnp.full((B, M, 1), jnp.inf, jnp.float32), h], axis=2)               # (B, M, L+1)
        s_prev_min = jnp.minimum(padded[:, :, :-1], padded[:, :, 1:])             # (B, M, L)
        s_t = dist + s_prev_min
        o_t = jnp.matmul(s_t, o_hot)   # literal torch.matmul: inf*0 -> NaN during warm-up
        o_list.append(o_t)
        s_list.append(s_t)
        h = s_t
    return jnp.stack(o_list), jnp.stack(s_list)


def init_hidden(B, M, L):
    h = jnp.concatenate(
        [jnp.zeros((M, 1), jnp.float32), jnp.full((M, L - 1), jnp.inf, jnp.float32)],
        axis=1)
    return jnp.tile(h[None], (B, 1, 1))


if __name__ == "__main__":
    B, M, L, D = 2, 8, 8, 16
    T = 8  # T >= L-1 so the +inf warm-up front has fully receded by the last step

    key = jax.random.PRNGKey(0)
    k1, k2 = jax.random.split(key)

    prototypes = jax.random.normal(k1, (M, L, D), jnp.float32)   # self.m
    u = jnp.ones((1, M), jnp.float32)                            # self.u
    u_bias = jnp.zeros((1, M), jnp.float32)                      # self.u_bias
    inputs_seq = jax.random.normal(k2, (T, B, D), jnp.float32)
    hidden = init_hidden(B, M, L)

    o_all, s_all = dtw_rnn_forward(inputs_seq, hidden, u, u_bias, prototypes)
    jax.block_until_ready((o_all, s_all))

    ro_all, rs_all = dtw_rnn_reference(inputs_seq, hidden, u, u_bias, prototypes)

    # s_t matches at every step (inf entries compare equal under allclose).
    assert bool(jnp.allclose(s_all, rs_all, rtol=1e-5, atol=1e-5))

    # o_t: the reference uses the literal one-hot matmul like PyTorch, which
    # produces NaN (inf * 0) while s_t still holds +inf during warm-up; the
    # kernel's column-select gives +inf there instead.  Check value-equality
    # wherever the reference is finite and +inf agreement elsewhere.
    finite = jnp.isfinite(ro_all)
    ok_finite = jnp.where(finite, jnp.isclose(o_all, ro_all, rtol=1e-5, atol=1e-5), True)
    ok_warmup = jnp.where(finite, True, jnp.isinf(o_all) & (o_all > 0))
    assert bool(jnp.all(ok_finite & ok_warmup))
    # Final step is fully finite (T >= L-1) and must match exactly.
    assert bool(jnp.isfinite(o_all[-1]).all())
    assert bool(jnp.allclose(o_all[-1], ro_all[-1], rtol=1e-5, atol=1e-5))

    print("KERNEL_OK")
</pallas_src>

<mosaic_0001>
module attributes {stable_mosaic.version = 11 : i64} {
  func.func @kernel(%arg0: i32, %arg1: i32, %arg2: memref<8x2x16xf32, #tpu.memory_space<vmem>>, %arg3: memref<1x64xf32, #tpu.memory_space<vmem>>, %arg4: memref<1x64xf32, #tpu.memory_space<vmem>>, %arg5: memref<16x64xf32, #tpu.memory_space<vmem>>, %arg6: memref<2x64xf32, #tpu.memory_space<any>>, %arg7: memref<8x2x64xf32, #tpu.memory_space<vmem>>, %arg8: memref<2x64xf32, #tpu.memory_space<vmem>>, %arg9: memref<!tpu.dma_semaphore, #tpu.memory_space<semaphore_mem>>) attributes {dimension_semantics = [#tpu.dimension_semantics<parallel>, #tpu.dimension_semantics<arbitrary>], iteration_bounds = array<i64: 1, 1>, scalar_prefetch = 0 : i64, scratch_operands = 2 : i64, tpu.core_type = #tpu.core_type<tc>, window_params = [{transform_indices = @transform_0, window_bounds = array<i64: 8, 2, 16>}, {pipeline_mode = #tpu.pipeline_mode<synchronous>, transform_indices = @transform_1, window_bounds = array<i64: 1, 64>}, {pipeline_mode = #tpu.pipeline_mode<synchronous>, transform_indices = @transform_2, window_bounds = array<i64: 1, 64>}, {pipeline_mode = #tpu.pipeline_mode<synchronous>, transform_indices = @transform_3, window_bounds = array<i64: 16, 64>}, {}, {transform_indices = @transform_5, window_bounds = array<i64: 8, 2, 64>}]} {
    %c0_i32 = arith.constant 0 : i32
    %0 = arith.cmpi eq, %arg1, %c0_i32 : i32
    %1 = arith.extui %0 : i1 to i32
    %c0_i32_0 = arith.constant 0 : i32
    %2 = arith.cmpi ne, %1, %c0_i32_0 : i32
    scf.if %2 {
      tpu.enqueue_dma source(%arg6 : memref<2x64xf32, #tpu.memory_space<any>>) target(%arg8 : memref<2x64xf32, #tpu.memory_space<vmem>>) target_semaphore(%arg9 : memref<!tpu.dma_semaphore, #tpu.memory_space<semaphore_mem>>)
      tpu.wait_dma2 semaphore(%arg9 : memref<!tpu.dma_semaphore, #tpu.memory_space<semaphore_mem>>) src(%arg6 : memref<2x64xf32, #tpu.memory_space<any>>) dst(%arg8 : memref<2x64xf32, #tpu.memory_space<vmem>>)
    } else {
    }
    %c0 = arith.constant 0 : index
    %c0_1 = arith.constant 0 : index
    %3 = vector.load %arg3[%c0, %c0_1] : memref<1x64xf32, #tpu.memory_space<vmem>>, vector<1x64xf32>
    %4 = vector.shape_cast %3 : vector<1x64xf32> to vector<1x1x64xf32>
    %c0_2 = arith.constant 0 : index
    %c0_3 = arith.constant 0 : index
    %5 = vector.load %arg4[%c0_2, %c0_3] : memref<1x64xf32, #tpu.memory_space<vmem>>, vector<1x64xf32>
    %6 = vector.shape_cast %5 : vector<1x64xf32> to vector<1x1x64xf32>
    %7 = tpu.iota {dimensions = array<i32: 1>} : vector<1x64xi32>
    %c8_i32 = arith.constant 8 : i32
    %c0_i32_4 = arith.constant 0 : i32
    %8 = arith.cmpi eq, %c8_i32, %c0_i32_4 : i32
    %c1_i32 = arith.constant 1 : i32
    %9 = arith.select %8, %c1_i32, %c8_i32 : i32
    %10 = vector.broadcast %9 : i32 to vector<1x64xi32>
    %11 = arith.remsi %7, %10 : vector<1x64xi32>
    %c0_i32_5 = arith.constant 0 : i32
    %12 = vector.broadcast %c0_i32_5 : i32 to vector<1x64xi32>
    %13 = arith.cmpi ne, %11, %12 : vector<1x64xi32>
    %c0_i32_6 = arith.constant 0 : i32
    %14 = vector.broadcast %c0_i32_6 : i32 to vector<1x64xi32>
    %15 = arith.cmpi slt, %11, %14 : vector<1x64xi32>
    %c0_i32_7 = arith.constant 0 : i32
    %16 = arith.cmpi slt, %9, %c0_i32_7 : i32
    %17 = vector.broadcast %16 : i1 to vector<1x64xi1>
    %18 = vector.broadcast %17 : vector<1x64xi1> to vector<1x64xi1>
    %19 = arith.xori %15, %18 : vector<1x64xi1>
    %20 = arith.andi %19, %13 : vector<1x64xi1>
    %21 = vector.broadcast %9 : i32 to vector<1x64xi32>
    %22 = arith.addi %11, %21 : vector<1x64xi32>
    %23 = arith.select %20, %22, %11 : vector<1x64xi1>, vector<1x64xi32>
    %c0_i32_8 = arith.constant 0 : i32
    %24 = vector.broadcast %c0_i32_8 : i32 to vector<1x64xi32>
    %25 = arith.cmpi eq, %23, %24 : vector<1x64xi32>
    %c0_9 = arith.constant 0 : index
    %c0_10 = arith.constant 0 : index
    %26 = vector.load %arg8[%c0_9, %c0_10] : memref<2x64xf32, #tpu.memory_space<vmem>>, vector<2x64xf32>
    %c0_i32_11 = arith.constant 0 : i32
    %27 = arith.index_cast %c0_i32_11 : i32 to index
    %c0_12 = arith.constant 0 : index
    %c0_13 = arith.constant 0 : index
    %28 = vector.load %arg2[%27, %c0_12, %c0_13] : memref<8x2x16xf32, #tpu.memory_space<vmem>>, vector<1x2x16xf32>
    %29 = vector.shape_cast %28 : vector<1x2x16xf32> to vector<2x16xf32>
    %30 = vector.shape_cast %29 : vector<2x16xf32> to vector<2x16x1xf32>
    %31 = vector.broadcast %30 : vector<2x16x1xf32> to vector<2x16x64xf32>
    %32 = vector.broadcast %4 : vector<1x1x64xf32> to vector<2x16x64xf32>
    %33 = arith.mulf %31, %32 : vector<2x16x64xf32>
    %34 = vector.broadcast %6 : vector<1x1x64xf32> to vector<2x16x64xf32>
    %35 = arith.addf %33, %34 : vector<2x16x64xf32>
    %c0_14 = arith.constant 0 : index
    %c0_15 = arith.constant 0 : index
    %36 = vector.load %arg5[%c0_14, %c0_15] : memref<16x64xf32, #tpu.memory_space<vmem>>, vector<16x64xf32>
    %37 = vector.shape_cast %36 : vector<16x64xf32> to vector<1x16x64xf32>
    %38 = vector.broadcast %37 : vector<1x16x64xf32> to vector<2x16x64xf32>
    %39 = arith.subf %38, %35 : vector<2x16x64xf32>
    %40 = math.absf %39 : vector<2x16x64xf32>
    %cst = arith.constant dense<0.000000e+00> : vector<2x64xf32>
    %41 = vector.multi_reduction <add>, %40, %cst [1] : vector<2x16x64xf32> to vector<2x64xf32>
    %c1_i32_16 = arith.constant 1 : i32
    %42 = tpu.dynamic_rotate %26 by %c1_i32_16 dim 1 : vector<2x64xf32>, i32 -> vector<2x64xf32>
    %cst_17 = arith.constant 0x7F800000 : f32
    %43 = vector.shape_cast %25 : vector<1x64xi1> to vector<1x64xi1>
    %44 = vector.broadcast %43 : vector<1x64xi1> to vector<2x64xi1>
    %45 = vector.broadcast %cst_17 : f32 to vector<2x64xf32>
    %46 = arith.select %44, %45, %42 : vector<2x64xi1>, vector<2x64xf32>
    %47 = arith.minimumf %26, %46 : vector<2x64xf32>
    %48 = arith.addf %41, %47 : vector<2x64xf32>
    %49 = arith.index_cast %c0_i32_11 : i32 to index
    %c0_18 = arith.constant 0 : index
    %c0_19 = arith.constant 0 : index
    %50 = vector.load %arg7[%49, %c0_18, %c0_19] : memref<8x2x64xf32, #tpu.memory_space<vmem>>, vector<1x2x64xf32>
    %51 = vector.shape_cast %50 : vector<1x2x64xf32> to vector<2x64xf32>
    %52 = vector.shape_cast %48 : vector<2x64xf32> to vector<1x2x64xf32>
    tpu.vector_store %arg7[%49, %c0_18, %c0_19], %52 {strides = array<i32>} : memref<8x2x64xf32, #tpu.memory_space<vmem>>, vector<1x2x64xf32>,
    %c1_i32_20 = arith.constant 1 : i32
    %53 = arith.index_cast %c1_i32_20 : i32 to index
    %c0_21 = arith.constant 0 : index
    %c0_22 = arith.constant 0 : index
    %54 = vector.load %arg2[%53, %c0_21, %c0_22] : memref<8x2x16xf32, #tpu.memory_space<vmem>>, vector<1x2x16xf32>
    %55 = vector.shape_cast %54 : vector<1x2x16xf32> to vector<2x16xf32>
    %56 = vector.shape_cast %55 : vector<2x16xf32> to vector<2x16x1xf32>
    %57 = vector.broadcast %56 : vector<2x16x1xf32> to vector<2x16x64xf32>
    %58 = vector.broadcast %4 : vector<1x1x64xf32> to vector<2x16x64xf32>
    %59 = arith.mulf %57, %58 : vector<2x16x64xf32>
    %60 = vector.broadcast %6 : vector<1x1x64xf32> to vector<2x16x64xf32>
    %61 = arith.addf %59, %60 : vector<2x16x64xf32>
    %c0_23 = arith.constant 0 : index
    %c0_24 = arith.constant 0 : index
    %62 = vector.load %arg5[%c0_23, %c0_24] : memref<16x64xf32, #tpu.memory_space<vmem>>, vector<16x64xf32>
    %63 = vector.shape_cast %62 : vector<16x64xf32> to vector<1x16x64xf32>
    %64 = vector.broadcast %63 : vector<1x16x64xf32> to vector<2x16x64xf32>
    %65 = arith.subf %64, %61 : vector<2x16x64xf32>
    %66 = math.absf %65 : vector<2x16x64xf32>
    %cst_25 = arith.constant dense<0.000000e+00> : vector<2x64xf32>
    %67 = vector.multi_reduction <add>, %66, %cst_25 [1] : vector<2x16x64xf32> to vector<2x64xf32>
    %c1_i32_26 = arith.constant 1 : i32
    %68 = tpu.dynamic_rotate %48 by %c1_i32_26 dim 1 : vector<2x64xf32>, i32 -> vector<2x64xf32>
    %cst_27 = arith.constant 0x7F800000 : f32
    %69 = vector.shape_cast %25 : vector<1x64xi1> to vector<1x64xi1>
    %70 = vector.broadcast %69 : vector<1x64xi1> to vector<2x64xi1>
    %71 = vector.broadcast %cst_27 : f32 to vector<2x64xf32>
    %72 = arith.select %70, %71, %68 : vector<2x64xi1>, vector<2x64xf32>
    %73 = arith.minimumf %48, %72 : vector<2x64xf32>
    %74 = arith.addf %67, %73 : vector<2x64xf32>
    %75 = arith.index_cast %c1_i32_20 : i32 to index
    %c0_28 = arith.constant 0 : index
    %c0_29 = arith.constant 0 : index
    %76 = vector.load %arg7[%75, %c0_28, %c0_29] : memref<8x2x64xf32, #tpu.memory_space<vmem>>, vector<1x2x64xf32>
    %77 = vector.shape_cast %76 : vector<1x2x64xf32> to vector<2x64xf32>
    %78 = vector.shape_cast %74 : vector<2x64xf32> to vector<1x2x64xf32>
    tpu.vector_store %arg7[%75, %c0_28, %c0_29], %78 {strides = array<i32>} : memref<8x2x64xf32, #tpu.memory_space<vmem>>, vector<1x2x64xf32>,
    %c2_i32 = arith.constant 2 : i32
    %79 = arith.index_cast %c2_i32 : i32 to index
    %c0_30 = arith.constant 0 : index
    %c0_31 = arith.constant 0 : index
    %80 = vector.load %arg2[%79, %c0_30, %c0_31] : memref<8x2x16xf32, #tpu.memory_space<vmem>>, vector<1x2x16xf32>
    %81 = vector.shape_cast %80 : vector<1x2x16xf32> to vector<2x16xf32>
    %82 = vector.shape_cast %81 : vector<2x16xf32> to vector<2x16x1xf32>
    %83 = vector.broadcast %82 : vector<2x16x1xf32> to vector<2x16x64xf32>
    %84 = vector.broadcast %4 : vector<1x1x64xf32> to vector<2x16x64xf32>
    %85 = arith.mulf %83, %84 : vector<2x16x64xf32>
    %86 = vector.broadcast %6 : vector<1x1x64xf32> to vector<2x16x64xf32>
    %87 = arith.addf %85, %86 : vector<2x16x64xf32>
    %c0_32 = arith.constant 0 : index
    %c0_33 = arith.constant 0 : index
    %88 = vector.load %arg5[%c0_32, %c0_33] : memref<16x64xf32, #tpu.memory_space<vmem>>, vector<16x64xf32>
    %89 = vector.shape_cast %88 : vector<16x64xf32> to vector<1x16x64xf32>
    %90 = vector.broadcast %89 : vector<1x16x64xf32> to vector<2x16x64xf32>
    %91 = arith.subf %90, %87 : vector<2x16x64xf32>
    %92 = math.absf %91 : vector<2x16x64xf32>
    %cst_34 = arith.constant dense<0.000000e+00> : vector<2x64xf32>
    %93 = vector.multi_reduction <add>, %92, %cst_34 [1] : vector<2x16x64xf32> to vector<2x64xf32>
    %c1_i32_35 = arith.constant 1 : i32
    %94 = tpu.dynamic_rotate %74 by %c1_i32_35 dim 1 : vector<2x64xf32>, i32 -> vector<2x64xf32>
    %cst_36 = arith.constant 0x7F800000 : f32
    %95 = vector.shape_cast %25 : vector<1x64xi1> to vector<1x64xi1>
    %96 = vector.broadcast %95 : vector<1x64xi1> to vector<2x64xi1>
    %97 = vector.broadcast %cst_36 : f32 to vector<2x64xf32>
    %98 = arith.select %96, %97, %94 : vector<2x64xi1>, vector<2x64xf32>
    %99 = arith.minimumf %74, %98 : vector<2x64xf32>
    %100 = arith.addf %93, %99 : vector<2x64xf32>
    %101 = arith.index_cast %c2_i32 : i32 to index
    %c0_37 = arith.constant 0 : index
    %c0_38 = arith.constant 0 : index
    %102 = vector.load %arg7[%101, %c0_37, %c0_38] : memref<8x2x64xf32, #tpu.memory_space<vmem>>, vector<1x2x64xf32>
    %103 = vector.shape_cast %102 : vector<1x2x64xf32> to vector<2x64xf32>
    %104 = vector.shape_cast %100 : vector<2x64xf32> to vector<1x2x64xf32>
    tpu.vector_store %arg7[%101, %c0_37, %c0_38], %104 {strides = array<i32>} : memref<8x2x64xf32, #tpu.memory_space<vmem>>, vector<1x2x64xf32>,
    %c3_i32 = arith.constant 3 : i32
    %105 = arith.index_cast %c3_i32 : i32 to index
    %c0_39 = arith.constant 0 : index
    %c0_40 = arith.constant 0 : index
    %106 = vector.load %arg2[%105, %c0_39, %c0_40] : memref<8x2x16xf32, #tpu.memory_space<vmem>>, vector<1x2x16xf32>
    %107 = vector.shape_cast %106 : vector<1x2x16xf32> to vector<2x16xf32>
    %108 = vector.shape_cast %107 : vector<2x16xf32> to vector<2x16x1xf32>
    %109 = vector.broadcast %108 : vector<2x16x1xf32> to vector<2x16x64xf32>
    %110 = vector.broadcast %4 : vector<1x1x64xf32> to vector<2x16x64xf32>
    %111 = arith.mulf %109, %110 : vector<2x16x64xf32>
    %112 = vector.broadcast %6 : vector<1x1x64xf32> to vector<2x16x64xf32>
    %113 = arith.addf %111, %112 : vector<2x16x64xf32>
    %c0_41 = arith.constant 0 : index
    %c0_42 = arith.constant 0 : index
    %114 = vector.load %arg5[%c0_41, %c0_42] : memref<16x64xf32, #tpu.memory_space<vmem>>, vector<16x64xf32>
    %115 = vector.shape_cast %114 : vector<16x64xf32> to vector<1x16x64xf32>
    %116 = vector.broadcast %115 : vector<1x16x64xf32> to vector<2x16x64xf32>
    %117 = arith.subf %116, %113 : vector<2x16x64xf32>
    %118 = math.absf %117 : vector<2x16x64xf32>
    %cst_43 = arith.constant dense<0.000000e+00> : vector<2x64xf32>
    %119 = vector.multi_reduction <add>, %118, %cst_43 [1] : vector<2x16x64xf32> to vector<2x64xf32>
    %c1_i32_44 = arith.constant 1 : i32
    %120 = tpu.dynamic_rotate %100 by %c1_i32_44 dim 1 : vector<2x64xf32>, i32 -> vector<2x64xf32>
    %cst_45 = arith.constant 0x7F800000 : f32
    %121 = vector.shape_cast %25 : vector<1x64xi1> to vector<1x64xi1>
    %122 = vector.broadcast %121 : vector<1x64xi1> to vector<2x64xi1>
    %123 = vector.broadcast %cst_45 : f32 to vector<2x64xf32>
    %124 = arith.select %122, %123, %120 : vector<2x64xi1>, vector<2x64xf32>
    %125 = arith.minimumf %100, %124 : vector<2x64xf32>
    %126 = arith.addf %119, %125 : vector<2x64xf32>
    %127 = arith.index_cast %c3_i32 : i32 to index
    %c0_46 = arith.constant 0 : index
    %c0_47 = arith.constant 0 : index
    %128 = vector.load %arg7[%127, %c0_46, %c0_47] : memref<8x2x64xf32, #tpu.memory_space<vmem>>, vector<1x2x64xf32>
    %129 = vector.shape_cast %128 : vector<1x2x64xf32> to vector<2x64xf32>
    %130 = vector.shape_cast %126 : vector<2x64xf32> to vector<1x2x64xf32>
    tpu.vector_store %arg7[%127, %c0_46, %c0_47], %130 {strides = array<i32>} : memref<8x2x64xf32, #tpu.memory_space<vmem>>, vector<1x2x64xf32>,
    %c4_i32 = arith.constant 4 : i32
    %131 = arith.index_cast %c4_i32 : i32 to index
    %c0_48 = arith.constant 0 : index
    %c0_49 = arith.constant 0 : index
    %132 = vector.load %arg2[%131, %c0_48, %c0_49] : memref<8x2x16xf32, #tpu.memory_space<vmem>>, vector<1x2x16xf32>
    %133 = vector.shape_cast %132 : vector<1x2x16xf32> to vector<2x16xf32>
    %134 = vector.shape_cast %133 : vector<2x16xf32> to vector<2x16x1xf32>
    %135 = vector.broadcast %134 : vector<2x16x1xf32> to vector<2x16x64xf32>
    %136 = vector.broadcast %4 : vector<1x1x64xf32> to vector<2x16x64xf32>
    %137 = arith.mulf %135, %136 : vector<2x16x64xf32>
    %138 = vector.broadcast %6 : vector<1x1x64xf32> to vector<2x16x64xf32>
    %139 = arith.addf %137, %138 : vector<2x16x64xf32>
    %c0_50 = arith.constant 0 : index
    %c0_51 = arith.constant 0 : index
    %140 = vector.load %arg5[%c0_50, %c0_51] : memref<16x64xf32, #tpu.memory_space<vmem>>, vector<16x64xf32>
    %141 = vector.shape_cast %140 : vector<16x64xf32> to vector<1x16x64xf32>
    %142 = vector.broadcast %141 : vector<1x16x64xf32> to vector<2x16x64xf32>
    %143 = arith.subf %142, %139 : vector<2x16x64xf32>
    %144 = math.absf %143 : vector<2x16x64xf32>
    %cst_52 = arith.constant dense<0.000000e+00> : vector<2x64xf32>
    %145 = vector.multi_reduction <add>, %144, %cst_52 [1] : vector<2x16x64xf32> to vector<2x64xf32>
    %c1_i32_53 = arith.constant 1 : i32
    %146 = tpu.dynamic_rotate %126 by %c1_i32_53 dim 1 : vector<2x64xf32>, i32 -> vector<2x64xf32>
    %cst_54 = arith.constant 0x7F800000 : f32
    %147 = vector.shape_cast %25 : vector<1x64xi1> to vector<1x64xi1>
    %148 = vector.broadcast %147 : vector<1x64xi1> to vector<2x64xi1>
    %149 = vector.broadcast %cst_54 : f32 to vector<2x64xf32>
    %150 = arith.select %148, %149, %146 : vector<2x64xi1>, vector<2x64xf32>
    %151 = arith.minimumf %126, %150 : vector<2x64xf32>
    %152 = arith.addf %145, %151 : vector<2x64xf32>
    %153 = arith.index_cast %c4_i32 : i32 to index
    %c0_55 = arith.constant 0 : index
    %c0_56 = arith.constant 0 : index
    %154 = vector.load %arg7[%153, %c0_55, %c0_56] : memref<8x2x64xf32, #tpu.memory_space<vmem>>, vector<1x2x64xf32>
    %155 = vector.shape_cast %154 : vector<1x2x64xf32> to vector<2x64xf32>
    %156 = vector.shape_cast %152 : vector<2x64xf32> to vector<1x2x64xf32>
    tpu.vector_store %arg7[%153, %c0_55, %c0_56], %156 {strides = array<i32>} : memref<8x2x64xf32, #tpu.memory_space<vmem>>, vector<1x2x64xf32>,
    %c5_i32 = arith.constant 5 : i32
    %157 = arith.index_cast %c5_i32 : i32 to index
    %c0_57 = arith.constant 0 : index
    %c0_58 = arith.constant 0 : index
    %158 = vector.load %arg2[%157, %c0_57, %c0_58] : memref<8x2x16xf32, #tpu.memory_space<vmem>>, vector<1x2x16xf32>
    %159 = vector.shape_cast %158 : vector<1x2x16xf32> to vector<2x16xf32>
    %160 = vector.shape_cast %159 : vector<2x16xf32> to vector<2x16x1xf32>
    %161 = vector.broadcast %160 : vector<2x16x1xf32> to vector<2x16x64xf32>
    %162 = vector.broadcast %4 : vector<1x1x64xf32> to vector<2x16x64xf32>
    %163 = arith.mulf %161, %162 : vector<2x16x64xf32>
    %164 = vector.broadcast %6 : vector<1x1x64xf32> to vector<2x16x64xf32>
    %165 = arith.addf %163, %164 : vector<2x16x64xf32>
    %c0_59 = arith.constant 0 : index
    %c0_60 = arith.constant 0 : index
    %166 = vector.load %arg5[%c0_59, %c0_60] : memref<16x64xf32, #tpu.memory_space<vmem>>, vector<16x64xf32>
    %167 = vector.shape_cast %166 : vector<16x64xf32> to vector<1x16x64xf32>
    %168 = vector.broadcast %167 : vector<1x16x64xf32> to vector<2x16x64xf32>
    %169 = arith.subf %168, %165 : vector<2x16x64xf32>
    %170 = math.absf %169 : vector<2x16x64xf32>
    %cst_61 = arith.constant dense<0.000000e+00> : vector<2x64xf32>
    %171 = vector.multi_reduction <add>, %170, %cst_61 [1] : vector<2x16x64xf32> to vector<2x64xf32>
    %c1_i32_62 = arith.constant 1 : i32
    %172 = tpu.dynamic_rotate %152 by %c1_i32_62 dim 1 : vector<2x64xf32>, i32 -> vector<2x64xf32>
    %cst_63 = arith.constant 0x7F800000 : f32
    %173 = vector.shape_cast %25 : vector<1x64xi1> to vector<1x64xi1>
    %174 = vector.broadcast %173 : vector<1x64xi1> to vector<2x64xi1>
    %175 = vector.broadcast %cst_63 : f32 to vector<2x64xf32>
    %176 = arith.select %174, %175, %172 : vector<2x64xi1>, vector<2x64xf32>
    %177 = arith.minimumf %152, %176 : vector<2x64xf32>
    %178 = arith.addf %171, %177 : vector<2x64xf32>
    %179 = arith.index_cast %c5_i32 : i32 to index
    %c0_64 = arith.constant 0 : index
    %c0_65 = arith.constant 0 : index
    %180 = vector.load %arg7[%179, %c0_64, %c0_65] : memref<8x2x64xf32, #tpu.memory_space<vmem>>, vector<1x2x64xf32>
    %181 = vector.shape_cast %180 : vector<1x2x64xf32> to vector<2x64xf32>
    %182 = vector.shape_cast %178 : vector<2x64xf32> to vector<1x2x64xf32>
    tpu.vector_store %arg7[%179, %c0_64, %c0_65], %182 {strides = array<i32>} : memref<8x2x64xf32, #tpu.memory_space<vmem>>, vector<1x2x64xf32>,
    %c6_i32 = arith.constant 6 : i32
    %183 = arith.index_cast %c6_i32 : i32 to index
    %c0_66 = arith.constant 0 : index
    %c0_67 = arith.constant 0 : index
    %184 = vector.load %arg2[%183, %c0_66, %c0_67] : memref<8x2x16xf32, #tpu.memory_space<vmem>>, vector<1x2x16xf32>
    %185 = vector.shape_cast %184 : vector<1x2x16xf32> to vector<2x16xf32>
    %186 = vector.shape_cast %185 : vector<2x16xf32> to vector<2x16x1xf32>
    %187 = vector.broadcast %186 : vector<2x16x1xf32> to vector<2x16x64xf32>
    %188 = vector.broadcast %4 : vector<1x1x64xf32> to vector<2x16x64xf32>
    %189 = arith.mulf %187, %188 : vector<2x16x64xf32>
    %190 = vector.broadcast %6 : vector<1x1x64xf32> to vector<2x16x64xf32>
    %191 = arith.addf %189, %190 : vector<2x16x64xf32>
    %c0_68 = arith.constant 0 : index
    %c0_69 = arith.constant 0 : index
    %192 = vector.load %arg5[%c0_68, %c0_69] : memref<16x64xf32, #tpu.memory_space<vmem>>, vector<16x64xf32>
    %193 = vector.shape_cast %192 : vector<16x64xf32> to vector<1x16x64xf32>
    %194 = vector.broadcast %193 : vector<1x16x64xf32> to vector<2x16x64xf32>
    %195 = arith.subf %194, %191 : vector<2x16x64xf32>
    %196 = math.absf %195 : vector<2x16x64xf32>
    %cst_70 = arith.constant dense<0.000000e+00> : vector<2x64xf32>
    %197 = vector.multi_reduction <add>, %196, %cst_70 [1] : vector<2x16x64xf32> to vector<2x64xf32>
    %c1_i32_71 = arith.constant 1 : i32
    %198 = tpu.dynamic_rotate %178 by %c1_i32_71 dim 1 : vector<2x64xf32>, i32 -> vector<2x64xf32>
    %cst_72 = arith.constant 0x7F800000 : f32
    %199 = vector.shape_cast %25 : vector<1x64xi1> to vector<1x64xi1>
    %200 = vector.broadcast %199 : vector<1x64xi1> to vector<2x64xi1>
    %201 = vector.broadcast %cst_72 : f32 to vector<2x64xf32>
    %202 = arith.select %200, %201, %198 : vector<2x64xi1>, vector<2x64xf32>
    %203 = arith.minimumf %178, %202 : vector<2x64xf32>
    %204 = arith.addf %197, %203 : vector<2x64xf32>
    %205 = arith.index_cast %c6_i32 : i32 to index
    %c0_73 = arith.constant 0 : index
    %c0_74 = arith.constant 0 : index
    %206 = vector.load %arg7[%205, %c0_73, %c0_74] : memref<8x2x64xf32, #tpu.memory_space<vmem>>, vector<1x2x64xf32>
    %207 = vector.shape_cast %206 : vector<1x2x64xf32> to vector<2x64xf32>
    %208 = vector.shape_cast %204 : vector<2x64xf32> to vector<1x2x64xf32>
    tpu.vector_store %arg7[%205, %c0_73, %c0_74], %208 {strides = array<i32>} : memref<8x2x64xf32, #tpu.memory_space<vmem>>, vector<1x2x64xf32>,
    %c7_i32 = arith.constant 7 : i32
    %209 = arith.index_cast %c7_i32 : i32 to index
    %c0_75 = arith.constant 0 : index
    %c0_76 = arith.constant 0 : index
    %210 = vector.load %arg2[%209, %c0_75, %c0_76] : memref<8x2x16xf32, #tpu.memory_space<vmem>>, vector<1x2x16xf32>
    %211 = vector.shape_cast %210 : vector<1x2x16xf32> to vector<2x16xf32>
    %212 = vector.shape_cast %211 : vector<2x16xf32> to vector<2x16x1xf32>
    %213 = vector.broadcast %212 : vector<2x16x1xf32> to vector<2x16x64xf32>
    %214 = vector.broadcast %4 : vector<1x1x64xf32> to vector<2x16x64xf32>
    %215 = arith.mulf %213, %214 : vector<2x16x64xf32>
    %216 = vector.broadcast %6 : vector<1x1x64xf32> to vector<2x16x64xf32>
    %217 = arith.addf %215, %216 : vector<2x16x64xf32>
    %c0_77 = arith.constant 0 : index
    %c0_78 = arith.constant 0 : index
    %218 = vector.load %arg5[%c0_77, %c0_78] : memref<16x64xf32, #tpu.memory_space<vmem>>, vector<16x64xf32>
    %219 = vector.shape_cast %218 : vector<16x64xf32> to vector<1x16x64xf32>
    %220 = vector.broadcast %219 : vector<1x16x64xf32> to vector<2x16x64xf32>
    %221 = arith.subf %220, %217 : vector<2x16x64xf32>
    %222 = math.absf %221 : vector<2x16x64xf32>
    %cst_79 = arith.constant dense<0.000000e+00> : vector<2x64xf32>
    %223 = vector.multi_reduction <add>, %222, %cst_79 [1] : vector<2x16x64xf32> to vector<2x64xf32>
    %c1_i32_80 = arith.constant 1 : i32
    %224 = tpu.dynamic_rotate %204 by %c1_i32_80 dim 1 : vector<2x64xf32>, i32 -> vector<2x64xf32>
    %cst_81 = arith.constant 0x7F800000 : f32
    %225 = vector.shape_cast %25 : vector<1x64xi1> to vector<1x64xi1>
    %226 = vector.broadcast %225 : vector<1x64xi1> to vector<2x64xi1>
    %227 = vector.broadcast %cst_81 : f32 to vector<2x64xf32>
    %228 = arith.select %226, %227, %224 : vector<2x64xi1>, vector<2x64xf32>
    %229 = arith.minimumf %204, %228 : vector<2x64xf32>
    %230 = arith.addf %223, %229 : vector<2x64xf32>
    %231 = arith.index_cast %c7_i32 : i32 to index
    %c0_82 = arith.constant 0 : index
    %c0_83 = arith.constant 0 : index
    %232 = vector.load %arg7[%231, %c0_82, %c0_83] : memref<8x2x64xf32, #tpu.memory_space<vmem>>, vector<1x2x64xf32>
    %233 = vector.shape_cast %232 : vector<1x2x64xf32> to vector<2x64xf32>
    %234 = vector.shape_cast %230 : vector<2x64xf32> to vector<1x2x64xf32>
    tpu.vector_store %arg7[%231, %c0_82, %c0_83], %234 {strides = array<i32>} : memref<8x2x64xf32, #tpu.memory_space<vmem>>, vector<1x2x64xf32>,
    %c8_i32_84 = arith.constant 8 : i32
    %c0_85 = arith.constant 0 : index
    %c0_86 = arith.constant 0 : index
    %235 = vector.load %arg8[%c0_85, %c0_86] : memref<2x64xf32, #tpu.memory_space<vmem>>, vector<2x64xf32>
    tpu.vector_store %arg8[%c0_85, %c0_86], %230 {strides = array<i32>} : memref<2x64xf32, #tpu.memory_space<vmem>>, vector<2x64xf32>,
    return
  }
  func.func @transform_0(%arg0: i32, %arg1: i32) -> (i32, i32, i32) {
    %c0_i32 = arith.constant 0 : i32
    %c0_i32_0 = arith.constant 0 : i32
    return %arg1, %arg0, %c0_i32 : i32, i32, i32
  }
  func.func @transform_1(%arg0: i32, %arg1: i32) -> (i32, i32) {
    %c0_i32 = arith.constant 0 : i32
    %c0_i32_0 = arith.constant 0 : i32
    %c0_i32_1 = arith.constant 0 : i32
    return %c0_i32, %c0_i32_0 : i32, i32
  }
  func.func @transform_2(%arg0: i32, %arg1: i32) -> (i32, i32) {
    %c0_i32 = arith.constant 0 : i32
    %c0_i32_0 = arith.constant 0 : i32
    %c0_i32_1 = arith.constant 0 : i32
    return %c0_i32, %c0_i32_0 : i32, i32
  }
  func.func @transform_3(%arg0: i32, %arg1: i32) -> (i32, i32) {
    %c0_i32 = arith.constant 0 : i32
    %c0_i32_0 = arith.constant 0 : i32
    %c0_i32_1 = arith.constant 0 : i32
    return %c0_i32, %c0_i32_0 : i32, i32
  }
  func.func @transform_5(%arg0: i32, %arg1: i32) -> (i32, i32, i32) {
    %c0_i32 = arith.constant 0 : i32
    %c0_i32_0 = arith.constant 0 : i32
    return %arg1, %arg0, %c0_i32 : i32, i32, i32
  }
}

</mosaic_0001>

<bundles_post_ra>
// kernel: tpu_custom_call.1
= control target key start
LH: loop header
LB: loop body
LE: loop exit
PB: predicated region body
PF: predicated region fallthrough
CT: control target
= control target key end

     0   :  { %10 = vsyncpa [#allocation5], 0  ;;  %s1393_s0 = inlined_call_operand.hbm [shape: f32[8,2,16], index: 0, kind: input, shape index: {}]   ;;  %s1394_s1 = inlined_call_operand.hbm [shape: f32[1,64], index: 1, kind: input, shape index: {}]   ;;  %s1395_s2 = inlined_call_operand.hbm [shape: f32[1,64], index: 2, kind: input, shape index: {}]   ;;  %s1396_s3 = inlined_call_operand.hbm [shape: f32[16,64], index: 3, kind: input, shape index: {}]   ;;  %s1397_s4 = inlined_call_operand.hbm [shape: f32[2,64], index: 4, kind: input, shape index: {}]   ;;  %s1398_s5 = inlined_call_operand.hbm [shape: f32[8,2,64], index: 5, kind: output, shape index: {}]  }
   0x1   :  { %11 = vsyncpa [#allocation8], 0 }
   0x2   :  { %12 = vsyncpa [#allocation11], 0 }
   0x3   :  { %13 = vsyncpa [#allocation6], 0  ;;  %s992_s18 = smov [#allocation7]   ;;  %s993_s20 = smov [#allocation4]  }
   0x4   :  { %s32_s19 = sshll.u32 %s992_s18, 4  ;;  %s19_s21 = sshll.u32 %s993_s20, 4  ;;  %s33_s19 = int_to_ptr.vmem [resolvable:$true] %s32_s19  ;;  %s1034_s21 = int_to_ptr.vmem [resolvable:$true] %s19_s21 }
   0x5   :  { %s850_s24 = scalar_lea.hbm %s1394_s1, 16 }
   0x6   :  { %p851_p0 = scmp.ne.s32.totalorder %s1394_s1, %s850_s24  ;;  %p854_p1 = scmp.lt.u32.totalorder %s850_s24, %s1394_s1 }
   0x8   :  { %p856_p2 = pnand %p854_p1, %p851_p0 }
   0xa   :  { %859 = shalt.err (!%p856_p2)
}
   0xb   :  { %s860_s29 = scalar_lea.vmem %s33_s19, 16  ;;  %s864_s30 = scalar_lea.vmem %s33_s19, 32 }
   0xc   :  { %p861_p3 = scmp.ne.s32.totalorder %s33_s19, %s860_s29  ;;  %p865_p4 = scmp.lt.s32.totalorder %s33_s19, %s33_s19 }
   0xd   :  { %p866_p5 = scmp.lt.s32.totalorder %s864_s30, %s860_s29 }
   0xf   :  { %p867_p6 = por %p866_p5, %p865_p4 }
  0x11   :  { %p868_p7 = pnand %p867_p6, %p861_p3 }
  0x13   :  { %871 = shalt.err (!%p868_p7)
}
  0x14   :  { %35 = dma.hbm_to_vmem [thread:$0]  %s1394_s1, 16, %s33_s19, [#allocation8]  }
  0x15   :  { %s872_s10 = scalar_lea.hbm %s1393_s0, 256 }
  0x16   :  { %p873_p8 = scmp.ne.s32.totalorder %s1393_s0, %s872_s10  ;;  %p876_p9 = scmp.lt.u32.totalorder %s872_s10, %s1393_s0 }
  0x18   :  { %p878_p10 = pnand %p876_p9, %p873_p8 }
  0x1a   :  { %881 = shalt.err (!%p878_p10)
}
  0x1b   :  { %s882_s15 = scalar_lea.vmem %s1034_s21, 256  ;;  %p887_p12 = scmp.lt.s32.totalorder %s1034_s21, %s1034_s21 }
  0x1c   :  { %p883_p11 = scmp.ne.s32.totalorder %s1034_s21, %s882_s15  ;;  %p888_p13 = scmp.lt.s32.totalorder %s882_s15, %s882_s15 }
  0x1e   :  { %p889_p0 = por %p888_p13, %p887_p12 }
  0x20   :  { %p890_p1 = pnand %p889_p0, %p883_p11 }
  0x22   :  { %893 = shalt.err (!%p890_p1)
}
  0x23   :  { %s994_s1 = smov 32   ;;  %s995_s16 = smov 2  }
  0x24   :  { %25 = dma.hbm_to_vmem [thread:$0]  %s1393_s0, 256, %s1034_s21, [#allocation5], %s994_s1, %s994_s1, %s995_s16  }
  0x25   :  { %s996_s19 = smov [#allocation9]   ;;  %s997_s22 = smov [#allocation10]  }
  0x26   :  { %s42_s20 = sshll.u32 %s996_s19, 4  ;;  %s51_s23 = sshll.u32 %s997_s22, 4  ;;  %s43_s20 = int_to_ptr.vmem [resolvable:$true] %s42_s20  ;;  %s1068_s23 = int_to_ptr.vmem [resolvable:$true] %s51_s23 }
  0x27   :  { %s894_s26 = scalar_lea.hbm %s1395_s2, 16 }
  0x28   :  { %p895_p2 = scmp.ne.s32.totalorder %s1395_s2, %s894_s26  ;;  %p898_p3 = scmp.lt.u32.totalorder %s894_s26, %s1395_s2 }
  0x2a   :  { %p900_p4 = pnand %p898_p3, %p895_p2 }
  0x2c   :  { %903 = shalt.err (!%p900_p4)
}
  0x2d   :  { %s904_s0 = scalar_lea.vmem %s43_s20, 16  ;;  %s908_s21 = scalar_lea.vmem %s43_s20, 32 }
  0x2e   :  { %p905_p5 = scmp.ne.s32.totalorder %s43_s20, %s904_s0  ;;  %p909_p6 = scmp.lt.s32.totalorder %s43_s20, %s43_s20 }
  0x2f   :  { %p910_p7 = scmp.lt.s32.totalorder %s908_s21, %s904_s0 }
  0x31   :  { %p911_p8 = por %p910_p7, %p909_p6 }
  0x33   :  { %p912_p9 = pnand %p911_p8, %p905_p5 }
  0x35   :  { %915 = shalt.err (!%p912_p9)
}
  0x36   :  { %45 = dma.hbm_to_vmem [thread:$0]  %s1395_s2, 16, %s43_s20, [#allocation8]  }
  0x37   :  { %s916_s10 = scalar_lea.hbm %s1396_s3, 256 }
  0x38   :  { %p917_p10 = scmp.ne.s32.totalorder %s1396_s3, %s916_s10  ;;  %p920_p11 = scmp.lt.u32.totalorder %s916_s10, %s1396_s3 }
  0x3a   :  { %p922_p12 = pnand %p920_p11, %p917_p10 }
  0x3c   :  { %925 = shalt.err (!%p922_p12)
}
  0x3d   :  { %s926_s15 = scalar_lea.vmem %s1068_s23, 256  ;;  %p931_p0 = scmp.lt.s32.totalorder %s1068_s23, %s1068_s23 }
  0x3e   :  { %p927_p13 = scmp.ne.s32.totalorder %s1068_s23, %s926_s15  ;;  %p932_p1 = scmp.lt.s32.totalorder %s926_s15, %s926_s15 }
  0x40   :  { %p933_p2 = por %p932_p1, %p931_p0 }
  0x42   :  { %p934_p3 = pnand %p933_p2, %p927_p13 }
  0x44   :  { %937 = shalt.err (!%p934_p3)
}
  0x45   :  { %s998_s2 = smov 128   ;;  %s999_s17 = smov 8  }
  0x46   :  { %57 = dma.hbm_to_vmem [thread:$0]  %s1396_s3, 256, %s1068_s23, [#allocation11], %s998_s2, %s998_s2, %s999_s17  }
  0x47   :  { %982 = dma.done.wait [#allocation5], 256  }
  0x48   :  { %983 = vsyncadd [#allocation5], 4294967040 }
  0x49   :  { %984 = dma.done.wait [#allocation8], 32  }
  0x4a   :  { %985 = vsyncadd [#allocation8], 4294967264 }
  0x4b   :  { %986 = dma.done.wait [#allocation11], 256  }
  0x4c   :  { %987 = vsyncadd [#allocation11], 4294967040  ;;  %s1000_s20 = smov [#allocation2]   ;;  %s938_s26 = scalar_lea.hbm %s1397_s4, 32 }
  0x4d   :  { %s81_s22 = sshll.u32 %s1000_s20, 4  ;;  %p939_p4 = scmp.ne.s32.totalorder %s1397_s4, %s938_s26  ;;  %s82_s22 = int_to_ptr.vmem [resolvable:$true] %s81_s22 }
  0x4e   :  { %p942_p5 = scmp.lt.u32.totalorder %s938_s26, %s1397_s4 }
  0x50   :  { %p944_p6 = pnand %p942_p5, %p939_p4 }
  0x52   :  { %947 = shalt.err (!%p944_p6)  }
  0x53   :  { %s948_s3 = scalar_lea.vmem %s82_s22, 32  ;;  %p953_p8 = scmp.lt.s32.totalorder %s82_s22, %s82_s22 }
  0x54   :  { %p949_p7 = scmp.ne.s32.totalorder %s82_s22, %s948_s3  ;;  %p954_p9 = scmp.lt.s32.totalorder %s948_s3, %s948_s3 }
  0x56   :  { %p955_p10 = por %p954_p9, %p953_p8 }
  0x58   :  { %p956_p11 = pnand %p955_p10, %p949_p7 }
  0x5a   :  { %959 = shalt.err (!%p956_p11)  }
  0x5b   :  { %84 = dma.hbm_to_vmem [thread:$0]  %s1397_s4, 32, %s82_s22, [#allocation3] }
  0x5c   :  { %988 = dma.done.wait [#allocation3], 32 }
  0x5d   :  { %989 = vsyncadd [#allocation3], 4294967264  ;;  %v90_v0 = vlaneseq  ;;  %v1113_v3 = vld [vmem:[#allocation2] sm:$0x3]  ;;  %v106_v4 = vld [vmem:[#allocation4] sm:$0x3] }
  0x5e   :  { %s1001_s21 = smov 64   ;;  %vm178_vm0 = vcmask 1048064   ;;  %s1002_s4 = smov 65   ;;  %v1127_v14 = vld [vmem:[#allocation7] ss:$0 sm:$0xff]  ;;  %v1137_v24 = vld [vmem:[#allocation10] sm:$0xff] }
  0x5f   :  { %v108_v1 = vshrl.u32 %v90_v0, 7  ;;  %179 = vrot.lane.b32.xlu0 %v1113_v3, %s1001_s21  ;;  %v1131_v19 = vld [vmem:[#allocation9] ss:$0 sm:$0xff]  ;;  %v1139_v25 = vld [vmem:[#allocation10 + $0x8] sm:$0xff]  ;;  %vm159_vm1 = vcmask 523264   ;;  %v91_v45 = vand.u32 127, %v90_v0 }
  0x60   :  { %vm202_vm3 = vcmask 1041409   ;;  %vm205_vm4 = vcmask 517120   ;;  %v208_v0 = vld [vmem:[#allocation4 + $0x2] sm:$0x3]  ;;  %s1003_s6 = smov [#allocation12]  }
  0x61   :  { %v1111_v2 = vsub.s32 1, %v108_v1  ;;  %v1118_v6 = vsub.s32 0, %v108_v1  ;;  %v96_v48 = vand.u32 7, %v91_v45  ;;  %s815_s7 = sshll.u32 %s1003_s6, 4  ;;  %s816_s7 = int_to_ptr.vmem [resolvable:$true] %s815_s7 }
  0x62   :  { %s960_s8 = scalar_lea.vmem %s816_s7, 256  ;;  %p965_p13 = scmp.lt.s32.totalorder %s816_s7, %s816_s7 }
  0x63   :  { %v121_v5 = vrot.slane %v106_v4, %v1111_v2  ;;  %v110_v7 = vrot.slane %v106_v4, %v1118_v6  ;;  %vm1151_vm2 = vcmp.eq.s32.totalorder %v96_v48, 0  ;;  %v223_v4 = vrot.slane %v208_v0, %v1111_v2  ;;  %p961_p12 = scmp.ne.s32.totalorder %s816_s7, %s960_s8  ;;  %p966_p0 = scmp.lt.s32.totalorder %s960_s8, %s960_s8 }
  0x65   :  { %123 = vbcast.lane.b32.xlu1 %v121_v5, 256  ;;  %p967_p1 = por %p966_p0, %p965_p13 }
  0x67   :  { %p968_p2 = pnand %p967_p1, %p961_p12 }
  0x69   :  { %127 = vbcast.lane.b32.xlu1 %v121_v5, 264 }
  0x6d   :  { %116 = vbcast.lane.b32.xlu1 %v110_v7, 264 }
  0xd1   :  { %v180_v8 = vpop.permute.xlu0 %179 }
  0xd2   :  { %v181_v9 = vsel %vm178_vm0, %v180_v8, %v1113_v3 }
  0xd3   :  { %182 = vrot.lane.b32.xlu0 %v181_v9, %s1001_s21 }
  0xd7   :  { %112 = vbcast.lane.b32.xlu0 %v110_v7, 256  ;;  %v124_v12 = vpop.permute.xlu1 %123 }
  0xd8   :  { %v137_v17 = vmul.f32 %v1127_v14, %v124_v12 }
  0xda   :  { %v147_v22 = vadd.f32 %v1131_v19, %v137_v17 }
  0xdb   :  { %v128_v13 = vpop.permute.xlu1 %127 }
  0xdc   :  { %v138_v18 = vmul.f32 %v1127_v14, %v128_v13  ;;  %v153_v28 = vsub.f32 %v1137_v24, %v147_v22 }
  0xde   :  { %v148_v23 = vadd.f32 %v1131_v19, %v138_v18  ;;  %v157_v32 = vand.u32 2147483647, %v153_v28 }
  0xdf   :  { %v117_v15 = vpop.permute.xlu1 %116 }
  0xe0   :  { %v136_v20 = vmul.f32 %v1127_v14, %v117_v15  ;;  %v154_v29 = vsub.f32 %v1139_v25, %v148_v23  ;;  %v169_v36 = vsel %vm159_vm1, %v157_v32, 0.0 }
  0xe2   :  { %v146_v26 = vadd.f32 %v1131_v19, %v136_v20  ;;  %v158_v33 = vand.u32 2147483647, %v154_v29 }
  0xe4   :  { %v152_v30 = vsub.f32 %v1139_v25, %v146_v26  ;;  %v170_v37 = vsel %vm159_vm1, %v158_v33, 0.0 }
  0xe5   :  { %v171_v40 = vadd.f32 %v170_v37, %v169_v36 }
  0xe6   :  { %v156_v34 = vand.u32 2147483647, %v152_v30 }
  0xe7   :  { %v172_v42 = vrot.slane %v171_v40, 4 }
  0xe8   :  { %v161_v38 = vsel %vm159_vm1, %v156_v34, 0.0 }
  0xe9   :  { %v173_v44 = vadd.f32 %v172_v42, %v171_v40 }
  0xeb   :  { %v174_v47 = vrot.slane %v173_v44, 2 }
  0xed   :  { %v175_v50 = vadd.f32 %v174_v47, %v173_v44 }
  0xef   :  { %v176_v54 = vrot.slane %v175_v50, 1 }
  0xf1   :  { %v177_v58 = vadd.f32 %v176_v54, %v175_v50 }
 0x145   :  { %v183_v10 = vpop.permute.xlu0 %182 }
 0x146   :  { %v184_v11 = vsel %vm178_vm0, %v183_v10, %v1113_v3 }
 0x147   :  { %188 = vrot.lane.b32.xlu0 %v184_v11, %s1002_s4 }
 0x149   :  { %v113_v16 = vpop.permute.xlu0 %112 }
 0x14a   :  { %v135_v21 = vmul.f32 %v1127_v14, %v113_v16 }
 0x14c   :  { %v145_v27 = vadd.f32 %v1131_v19, %v135_v21 }
 0x14e   :  { %v151_v31 = vsub.f32 %v1137_v24, %v145_v27 }
 0x150   :  { %v155_v35 = vand.u32 2147483647, %v151_v31 }
 0x152   :  { %v160_v39 = vsel %vm159_vm1, %v155_v35, 0.0 }
 0x153   :  { %v162_v41 = vadd.f32 %v161_v38, %v160_v39 }
 0x155   :  { %v163_v43 = vrot.slane %v162_v41, 4 }
 0x157   :  { %v164_v46 = vadd.f32 %v163_v43, %v162_v41 }
 0x159   :  { %v165_v49 = vrot.slane %v164_v46, 2 }
 0x15b   :  { %v166_v52 = vadd.f32 %v165_v49, %v164_v46 }
 0x15d   :  { %v167_v56 = vrot.slane %v166_v52, 1 }
 0x15f   :  { %v168_v60 = vadd.f32 %v167_v56, %v166_v52 }
 0x1b9   :  { %v189_v53 = vpop.permute.xlu0 %188 }
 0x1ba   :  { %v191_v55 = vsel %vm1151_vm2, inf, %v189_v53 }
 0x1bb   :  { %v192_v57 = vmin.f32 %v1113_v3, %v191_v55  ;;  %v212_v3 = vrot.slane %v208_v0, %v1118_v6 }
 0x1bd   :  { %v194_v59 = vrot.slane %v192_v57, 1  ;;  %v1158_v62 = vadd.f32 %v192_v57, %v168_v60 }
 0x1bf   :  { %v198_v61 = vadd.f32 %v194_v59, %v177_v58 }
 0x1c1   :  { %v201_v63 = vrot.slane %v198_v61, 7 }
 0x1c3   :  { %v203_v1 = vsel %vm202_vm3, %v201_v63, %v1158_v62  ;;  %v294_v63 = vld [vmem:[#allocation4 + $0x4] sm:$0x3] }
 0x1c4   :  { %267 = vrot.lane.b32.xlu1 %v203_v1, %s1001_s21  ;;  %206 = vst.msk [vmem:[#allocation12] sm:$0x3] %vm205_vm4, %v203_v1 }
 0x1c8   :  { %225 = vbcast.lane.b32.xlu1 %v223_v4, 256 }
 0x1cc   :  { %214 = vbcast.lane.b32.xlu1 %v212_v3, 256 }
 0x236   :  { %v268_v5 = vpop.permute.xlu1 %267 }
 0x237   :  { %v269_v7 = vsel %vm178_vm0, %v268_v5, %v203_v1 }
 0x238   :  { %270 = vrot.lane.b32.xlu0 %v269_v7, %s1001_s21 }
 0x23a   :  { %v226_v11 = vpop.permute.xlu1 %225 }
 0x23b   :  { %v233_v16 = vmul.f32 %v1127_v14, %v226_v11 }
 0x23c   :  { %229 = vbcast.lane.b32.xlu0 %v223_v4, 264  ;;  %v298_v4 = vrot.slane %v294_v63, %v1118_v6 }
 0x23d   :  { %v237_v21 = vadd.f32 %v1131_v19, %v233_v16 }
 0x23e   :  { %v215_v13 = vpop.permute.xlu1 %214 }
 0x23f   :  { %v231_v18 = vmul.f32 %v1127_v14, %v215_v13  ;;  %v243_v27 = vsub.f32 %v1137_v24, %v237_v21 }
 0x240   :  { %218 = vbcast.lane.b32.xlu0 %v212_v3, 264 }
 0x241   :  { %v235_v23 = vadd.f32 %v1131_v19, %v231_v18  ;;  %v247_v31 = vand.u32 2147483647, %v243_v27 }
 0x243   :  { %v241_v29 = vsub.f32 %v1137_v24, %v235_v23  ;;  %v258_v35 = vsel %vm159_vm1, %v247_v31, 0.0 }
 0x245   :  { %v245_v33 = vand.u32 2147483647, %v241_v29 }
 0x247   :  { %v249_v37 = vsel %vm159_vm1, %v245_v33, 0.0 }
 0x2aa   :  { %v271_v8 = vpop.permute.xlu0 %270 }
 0x2ab   :  { %v272_v9 = vsel %vm178_vm0, %v271_v8, %v203_v1  ;;  %v309_v1 = vrot.slane %v294_v63, %v1111_v2 }
 0x2ac   :  { %274 = vrot.lane.b32.xlu1 %v272_v9, %s1002_s4 }
 0x2ae   :  { %v230_v10 = vpop.permute.xlu0 %229 }
 0x2af   :  { %v234_v15 = vmul.f32 %v1127_v14, %v230_v10 }
 0x2b1   :  { %v238_v20 = vadd.f32 %v1131_v19, %v234_v15 }
 0x2b2   :  { %v219_v12 = vpop.permute.xlu0 %218 }
 0x2b3   :  { %v232_v17 = vmul.f32 %v1127_v14, %v219_v12  ;;  %v244_v26 = vsub.f32 %v1139_v25, %v238_v20 }
 0x2b5   :  { %v236_v22 = vadd.f32 %v1131_v19, %v232_v17  ;;  %v248_v30 = vand.u32 2147483647, %v244_v26 }
 0x2b7   :  { %v242_v28 = vsub.f32 %v1139_v25, %v236_v22  ;;  %v259_v34 = vsel %vm159_vm1, %v248_v30, 0.0 }
 0x2b8   :  { %v260_v38 = vadd.f32 %v259_v34, %v258_v35 }
 0x2b9   :  { %v246_v32 = vand.u32 2147483647, %v242_v28 }
 0x2ba   :  { %v261_v40 = vrot.slane %v260_v38, 4 }
 0x2bb   :  { %v250_v36 = vsel %vm159_vm1, %v246_v32, 0.0 }
 0x2bc   :  { %v251_v39 = vadd.f32 %v250_v36, %v249_v37  ;;  %v262_v42 = vadd.f32 %v261_v40, %v260_v38 }
 0x2be   :  { %v252_v41 = vrot.slane %v251_v39, 4  ;;  %v263_v44 = vrot.slane %v262_v42, 2 }
 0x2c0   :  { %v253_v43 = vadd.f32 %v252_v41, %v251_v39  ;;  %v264_v46 = vadd.f32 %v263_v44, %v262_v42 }
 0x2c2   :  { %v254_v45 = vrot.slane %v253_v43, 2  ;;  %v265_v48 = vrot.slane %v264_v46, 1 }
 0x2c4   :  { %v255_v47 = vadd.f32 %v254_v45, %v253_v43  ;;  %v266_v54 = vadd.f32 %v265_v48, %v264_v46 }
 0x2c6   :  { %v256_v52 = vrot.slane %v255_v47, 1 }
 0x2c8   :  { %v257_v57 = vadd.f32 %v256_v52, %v255_v47 }
 0x31e   :  { %v275_v49 = vpop.permute.xlu1 %274 }
 0x31f   :  { %v277_v50 = vsel %vm1151_vm2, inf, %v275_v49 }
 0x320   :  { %v279_v53 = vrot.slane %v277_v50, 1  ;;  %v282_v55 = vmin.f32 %v1158_v62, %v277_v50 }
 0x322   :  { %v283_v56 = vmin.f32 %v198_v61, %v279_v53  ;;  %v1189_v59 = vadd.f32 %v282_v55, %v257_v57 }
 0x324   :  { %v285_v58 = vadd.f32 %v283_v56, %v266_v54 }
 0x326   :  { %v288_v60 = vrot.slane %v285_v58, 7 }
 0x328   :  { %v289_v0 = vsel %vm202_vm3, %v288_v60, %v1189_v59  ;;  %v380_v60 = vld [vmem:[#allocation4 + $0x6] sm:$0x3] }
 0x329   :  { %353 = vrot.lane.b32.xlu0 %v289_v0, %s1001_s21  ;;  %292 = vst.msk [vmem:[#allocation12 + $0x2] sm:$0x3] %vm205_vm4, %v289_v0 }
 0x32d   :  { %311 = vbcast.lane.b32.xlu0 %v309_v1, 256 }
 0x331   :  { %300 = vbcast.lane.b32.xlu0 %v298_v4, 256 }
 0x39b   :  { %v354_v61 = vpop.permute.xlu0 %353 }
 0x39c   :  { %v355_v62 = vsel %vm178_vm0, %v354_v61, %v289_v0 }
 0x39d   :  { %356 = vrot.lane.b32.xlu1 %v355_v62, %s1001_s21 }
 0x39f   :  { %v312_v8 = vpop.permute.xlu0 %311 }
 0x3a0   :  { %v319_v12 = vmul.f32 %v1127_v14, %v312_v8 }
 0x3a1   :  { %315 = vbcast.lane.b32.xlu1 %v309_v1, 264  ;;  %v384_v1 = vrot.slane %v380_v60, %v1118_v6 }
 0x3a2   :  { %v323_v17 = vadd.f32 %v1131_v19, %v319_v12 }
 0x3a3   :  { %v301_v10 = vpop.permute.xlu0 %300 }
 0x3a4   :  { %v317_v15 = vmul.f32 %v1127_v14, %v301_v10  ;;  %v329_v22 = vsub.f32 %v1137_v24, %v323_v17 }
 0x3a5   :  { %304 = vbcast.lane.b32.xlu1 %v298_v4, 264 }
 0x3a6   :  { %v321_v20 = vadd.f32 %v1131_v19, %v317_v15  ;;  %v333_v28 = vand.u32 2147483647, %v329_v22 }
 0x3a8   :  { %v327_v26 = vsub.f32 %v1137_v24, %v321_v20  ;;  %v344_v32 = vsel %vm159_vm1, %v333_v28, 0.0 }
 0x3aa   :  { %v331_v30 = vand.u32 2147483647, %v327_v26 }
 0x3ac   :  { %v335_v34 = vsel %vm159_vm1, %v331_v30, 0.0 }
 0x40f   :  { %v357_v3 = vpop.permute.xlu1 %356 }
 0x410   :  { %v358_v5 = vsel %vm178_vm0, %v357_v3, %v289_v0  ;;  %v395_v0 = vrot.slane %v380_v60, %v1111_v2 }
 0x411   :  { %360 = vrot.lane.b32.xlu0 %v358_v5, %s1002_s4 }
 0x413   :  { %v316_v7 = vpop.permute.xlu1 %315 }
 0x414   :  { %v320_v11 = vmul.f32 %v1127_v14, %v316_v7 }
 0x416   :  { %v324_v16 = vadd.f32 %v1131_v19, %v320_v11 }
 0x417   :  { %v305_v9 = vpop.permute.xlu1 %304 }
 0x418   :  { %v318_v13 = vmul.f32 %v1127_v14, %v305_v9  ;;  %v330_v21 = vsub.f32 %v1139_v25, %v324_v16 }
 0x41a   :  { %v322_v18 = vadd.f32 %v1131_v19, %v318_v13  ;;  %v334_v27 = vand.u32 2147483647, %v330_v21 }
 0x41c   :  { %v328_v23 = vsub.f32 %v1139_v25, %v322_v18  ;;  %v345_v31 = vsel %vm159_vm1, %v334_v27, 0.0 }
 0x41d   :  { %v346_v35 = vadd.f32 %v345_v31, %v344_v32 }
 0x41e   :  { %v332_v29 = vand.u32 2147483647, %v328_v23 }
 0x41f   :  { %v347_v37 = vrot.slane %v346_v35, 4 }
 0x420   :  { %v336_v33 = vsel %vm159_vm1, %v332_v29, 0.0 }
 0x421   :  { %v337_v36 = vadd.f32 %v336_v33, %v335_v34  ;;  %v348_v39 = vadd.f32 %v347_v37, %v346_v35 }
 0x423   :  { %v338_v38 = vrot.slane %v337_v36, 4  ;;  %v349_v41 = vrot.slane %v348_v39, 2 }
 0x425   :  { %v339_v40 = vadd.f32 %v338_v38, %v337_v36  ;;  %v350_v43 = vadd.f32 %v349_v41, %v348_v39 }
 0x427   :  { %v340_v42 = vrot.slane %v339_v40, 2  ;;  %v351_v45 = vrot.slane %v350_v43, 1 }
 0x429   :  { %v341_v44 = vadd.f32 %v340_v42, %v339_v40  ;;  %v352_v50 = vadd.f32 %v351_v45, %v350_v43 }
 0x42b   :  { %v342_v48 = vrot.slane %v341_v44, 1 }
 0x42d   :  { %v343_v54 = vadd.f32 %v342_v48, %v341_v44 }
 0x483   :  { %v361_v46 = vpop.permute.xlu0 %360 }
 0x484   :  { %v363_v47 = vsel %vm1151_vm2, inf, %v361_v46 }
 0x485   :  { %v365_v49 = vrot.slane %v363_v47, 1  ;;  %v368_v52 = vmin.f32 %v1189_v59, %v363_v47 }
 0x487   :  { %v369_v53 = vmin.f32 %v285_v58, %v365_v49  ;;  %v1220_v56 = vadd.f32 %v368_v52, %v343_v54 }
 0x489   :  { %v371_v55 = vadd.f32 %v369_v53, %v352_v50 }
 0x48b   :  { %v374_v57 = vrot.slane %v371_v55, 7 }
 0x48d   :  { %v375_v63 = vsel %vm202_vm3, %v374_v57, %v1220_v56  ;;  %v466_v57 = vld [vmem:[#allocation4 + $0x8] sm:$0x3] }
 0x48e   :  { %439 = vrot.lane.b32.xlu1 %v375_v63, %s1001_s21  ;;  %378 = vst.msk [vmem:[#allocation12 + $0x4] sm:$0x3] %vm205_vm4, %v375_v63 }
 0x492   :  { %397 = vbcast.lane.b32.xlu1 %v395_v0, 256 }
 0x496   :  { %386 = vbcast.lane.b32.xlu1 %v384_v1, 256 }
 0x500   :  { %v440_v58 = vpop.permute.xlu1 %439 }
 0x501   :  { %v441_v59 = vsel %vm178_vm0, %v440_v58, %v375_v63 }
 0x502   :  { %442 = vrot.lane.b32.xlu0 %v441_v59, %s1001_s21 }
 0x504   :  { %v398_v3 = vpop.permute.xlu1 %397 }
 0x505   :  { %v405_v9 = vmul.f32 %v1127_v14, %v398_v3 }
 0x506   :  { %401 = vbcast.lane.b32.xlu0 %v395_v0, 264  ;;  %v470_v0 = vrot.slane %v466_v57, %v1118_v6 }
 0x507   :  { %v409_v13 = vadd.f32 %v1131_v19, %v405_v9 }
 0x508   :  { %v387_v7 = vpop.permute.xlu1 %386 }
 0x509   :  { %v403_v11 = vmul.f32 %v1127_v14, %v387_v7  ;;  %v415_v18 = vsub.f32 %v1137_v24, %v409_v13 }
 0x50a   :  { %390 = vbcast.lane.b32.xlu0 %v384_v1, 264 }
 0x50b   :  { %v407_v16 = vadd.f32 %v1131_v19, %v403_v11  ;;  %v419_v23 = vand.u32 2147483647, %v415_v18 }
 0x50d   :  { %v413_v21 = vsub.f32 %v1137_v24, %v407_v16  ;;  %v430_v29 = vsel %vm159_vm1, %v419_v23, 0.0 }
 0x50f   :  { %v417_v27 = vand.u32 2147483647, %v413_v21 }
 0x511   :  { %v421_v31 = vsel %vm159_vm1, %v417_v27, 0.0 }
 0x574   :  { %v443_v4 = vpop.permute.xlu0 %442 }
 0x575   :  { %v444_v61 = vsel %vm178_vm0, %v443_v4, %v375_v63  ;;  %v481_v63 = vrot.slane %v466_v57, %v1111_v2 }
 0x576   :  { %446 = vrot.lane.b32.xlu1 %v444_v61, %s1002_s4 }
 0x578   :  { %v402_v62 = vpop.permute.xlu0 %401 }
 0x579   :  { %v406_v8 = vmul.f32 %v1127_v14, %v402_v62 }
 0x57b   :  { %v410_v12 = vadd.f32 %v1131_v19, %v406_v8 }
 0x57c   :  { %v391_v5 = vpop.permute.xlu0 %390 }
 0x57d   :  { %v404_v10 = vmul.f32 %v1127_v14, %v391_v5  ;;  %v416_v17 = vsub.f32 %v1139_v25, %v410_v12 }
 0x57f   :  { %v408_v15 = vadd.f32 %v1131_v19, %v404_v10  ;;  %v420_v22 = vand.u32 2147483647, %v416_v17 }
 0x581   :  { %v414_v20 = vsub.f32 %v1139_v25, %v408_v15  ;;  %v431_v28 = vsel %vm159_vm1, %v420_v22, 0.0 }
 0x582   :  { %v432_v32 = vadd.f32 %v431_v28, %v430_v29 }
 0x583   :  { %v418_v26 = vand.u32 2147483647, %v414_v20 }
 0x584   :  { %v433_v34 = vrot.slane %v432_v32, 4 }
 0x585   :  { %v422_v30 = vsel %vm159_vm1, %v418_v26, 0.0 }
 0x586   :  { %v423_v33 = vadd.f32 %v422_v30, %v421_v31  ;;  %v434_v36 = vadd.f32 %v433_v34, %v432_v32 }
 0x588   :  { %v424_v35 = vrot.slane %v423_v33, 4  ;;  %v435_v38 = vrot.slane %v434_v36, 2 }
 0x58a   :  { %v425_v37 = vadd.f32 %v424_v35, %v423_v33  ;;  %v436_v40 = vadd.f32 %v435_v38, %v434_v36 }
 0x58c   :  { %v426_v39 = vrot.slane %v425_v37, 2  ;;  %v437_v42 = vrot.slane %v436_v40, 1 }
 0x58e   :  { %v427_v41 = vadd.f32 %v426_v39, %v425_v37  ;;  %v438_v47 = vadd.f32 %v437_v42, %v436_v40 }
 0x590   :  { %v428_v45 = vrot.slane %v427_v41, 1 }
 0x592   :  { %v429_v50 = vadd.f32 %v428_v45, %v427_v41 }
 0x5e8   :  { %v447_v43 = vpop.permute.xlu1 %446 }
 0x5e9   :  { %v449_v44 = vsel %vm1151_vm2, inf, %v447_v43 }
 0x5ea   :  { %v451_v46 = vrot.slane %v449_v44, 1  ;;  %v454_v48 = vmin.f32 %v1220_v56, %v449_v44 }
 0x5ec   :  { %v455_v49 = vmin.f32 %v371_v55, %v451_v46  ;;  %v1251_v53 = vadd.f32 %v454_v48, %v429_v50 }
 0x5ee   :  { %v457_v52 = vadd.f32 %v455_v49, %v438_v47 }
 0x5f0   :  { %v460_v54 = vrot.slane %v457_v52, 7 }
 0x5f2   :  { %v461_v60 = vsel %vm202_vm3, %v460_v54, %v1251_v53  ;;  %v552_v54 = vld [vmem:[#allocation4 + $0xa] sm:$0x3] }
 0x5f3   :  { %525 = vrot.lane.b32.xlu0 %v461_v60, %s1001_s21  ;;  %464 = vst.msk [vmem:[#allocation12 + $0x6] sm:$0x3] %vm205_vm4, %v461_v60 }
 0x5f7   :  { %483 = vbcast.lane.b32.xlu0 %v481_v63, 256 }
 0x5fb   :  { %472 = vbcast.lane.b32.xlu0 %v470_v0, 256 }
 0x665   :  { %v526_v55 = vpop.permute.xlu0 %525 }
 0x666   :  { %v527_v56 = vsel %vm178_vm0, %v526_v55, %v461_v60 }
 0x667   :  { %528 = vrot.lane.b32.xlu1 %v527_v56, %s1001_s21 }
 0x669   :  { %v484_v4 = vpop.permute.xlu0 %483 }
 0x66a   :  { %v491_v5 = vmul.f32 %v1127_v14, %v484_v4 }
 0x66b   :  { %487 = vbcast.lane.b32.xlu1 %v481_v63, 264  ;;  %v556_v63 = vrot.slane %v552_v54, %v1118_v6 }
 0x66c   :  { %v495_v10 = vadd.f32 %v1131_v19, %v491_v5 }
 0x66d   :  { %v473_v62 = vpop.permute.xlu0 %472 }
 0x66e   :  { %v489_v8 = vmul.f32 %v1127_v14, %v473_v62  ;;  %v501_v15 = vsub.f32 %v1137_v24, %v495_v10 }
 0x66f   :  { %476 = vbcast.lane.b32.xlu1 %v470_v0, 264 }
 0x670   :  { %v493_v12 = vadd.f32 %v1131_v19, %v489_v8  ;;  %v505_v20 = vand.u32 2147483647, %v501_v15 }
 0x672   :  { %v499_v17 = vsub.f32 %v1137_v24, %v493_v12  ;;  %v516_v26 = vsel %vm159_vm1, %v505_v20, 0.0 }
 0x674   :  { %v503_v22 = vand.u32 2147483647, %v499_v17 }
 0x676   :  { %v507_v28 = vsel %vm159_vm1, %v503_v22, 0.0 }
 0x6d9   :  { %v529_v1 = vpop.permute.xlu1 %528 }
 0x6da   :  { %v530_v58 = vsel %vm178_vm0, %v529_v1, %v461_v60  ;;  %v567_v60 = vrot.slane %v552_v54, %v1111_v2 }
 0x6db   :  { %532 = vrot.lane.b32.xlu0 %v530_v58, %s1002_s4 }
 0x6dd   :  { %v488_v59 = vpop.permute.xlu1 %487 }
 0x6de   :  { %v492_v3 = vmul.f32 %v1127_v14, %v488_v59 }
 0x6e0   :  { %v496_v9 = vadd.f32 %v1131_v19, %v492_v3 }
 0x6e1   :  { %v477_v61 = vpop.permute.xlu1 %476 }
 0x6e2   :  { %v490_v7 = vmul.f32 %v1127_v14, %v477_v61  ;;  %v502_v13 = vsub.f32 %v1139_v25, %v496_v9 }
 0x6e4   :  { %v494_v11 = vadd.f32 %v1131_v19, %v490_v7  ;;  %v506_v18 = vand.u32 2147483647, %v502_v13 }
 0x6e6   :  { %v500_v16 = vsub.f32 %v1139_v25, %v494_v11  ;;  %v517_v23 = vsel %vm159_vm1, %v506_v18, 0.0 }
 0x6e7   :  { %v518_v29 = vadd.f32 %v517_v23, %v516_v26 }
 0x6e8   :  { %v504_v21 = vand.u32 2147483647, %v500_v16 }
 0x6e9   :  { %v519_v31 = vrot.slane %v518_v29, 4 }
 0x6ea   :  { %v508_v27 = vsel %vm159_vm1, %v504_v21, 0.0 }
 0x6eb   :  { %v509_v30 = vadd.f32 %v508_v27, %v507_v28  ;;  %v520_v33 = vadd.f32 %v519_v31, %v518_v29 }
 0x6ed   :  { %v510_v32 = vrot.slane %v509_v30, 4  ;;  %v521_v35 = vrot.slane %v520_v33, 2 }
 0x6ef   :  { %v511_v34 = vadd.f32 %v510_v32, %v509_v30  ;;  %v522_v37 = vadd.f32 %v521_v35, %v520_v33 }
 0x6f1   :  { %v512_v36 = vrot.slane %v511_v34, 2  ;;  %v523_v39 = vrot.slane %v522_v37, 1 }
 0x6f3   :  { %v513_v38 = vadd.f32 %v512_v36, %v511_v34  ;;  %v524_v44 = vadd.f32 %v523_v39, %v522_v37 }
 0x6f5   :  { %v514_v42 = vrot.slane %v513_v38, 1 }
 0x6f7   :  { %v515_v47 = vadd.f32 %v514_v42, %v513_v38 }
 0x74d   :  { %v533_v40 = vpop.permute.xlu0 %532 }
 0x74e   :  { %v535_v41 = vsel %vm1151_vm2, inf, %v533_v40 }
 0x74f   :  { %v537_v43 = vrot.slane %v535_v41, 1  ;;  %v540_v45 = vmin.f32 %v1251_v53, %v535_v41 }
 0x751   :  { %v541_v46 = vmin.f32 %v457_v52, %v537_v43  ;;  %v1282_v49 = vadd.f32 %v540_v45, %v515_v47 }
 0x753   :  { %v543_v48 = vadd.f32 %v541_v46, %v524_v44 }
 0x755   :  { %v546_v50 = vrot.slane %v543_v48, 7 }
 0x757   :  { %v547_v57 = vsel %vm202_vm3, %v546_v50, %v1282_v49  ;;  %v638_v50 = vld [vmem:[#allocation4 + $0xc] sm:$0x3] }
 0x758   :  { %611 = vrot.lane.b32.xlu1 %v547_v57, %s1001_s21  ;;  %550 = vst.msk [vmem:[#allocation12 + $0x8] sm:$0x3] %vm205_vm4, %v547_v57 }
 0x75c   :  { %569 = vbcast.lane.b32.xlu1 %v567_v60, 256 }
 0x760   :  { %558 = vbcast.lane.b32.xlu1 %v556_v63, 256 }
 0x7ca   :  { %v612_v52 = vpop.permute.xlu1 %611 }
 0x7cb   :  { %v613_v53 = vsel %vm178_vm0, %v612_v52, %v547_v57 }
 0x7cc   :  { %614 = vrot.lane.b32.xlu0 %v613_v53, %s1001_s21 }
 0x7ce   :  { %v570_v1 = vpop.permute.xlu1 %569 }
 0x7cf   :  { %v577_v61 = vmul.f32 %v1127_v14, %v570_v1 }
 0x7d0   :  { %573 = vbcast.lane.b32.xlu0 %v567_v60, 264  ;;  %v642_v60 = vrot.slane %v638_v50, %v1118_v6 }
 0x7d1   :  { %v581_v7 = vadd.f32 %v1131_v19, %v577_v61 }
 0x7d2   :  { %v559_v59 = vpop.permute.xlu1 %558 }
 0x7d3   :  { %v575_v3 = vmul.f32 %v1127_v14, %v559_v59  ;;  %v587_v11 = vsub.f32 %v1137_v24, %v581_v7 }
 0x7d4   :  { %562 = vbcast.lane.b32.xlu0 %v556_v63, 264 }
 0x7d5   :  { %v579_v9 = vadd.f32 %v1131_v19, %v575_v3  ;;  %v591_v16 = vand.u32 2147483647, %v587_v11 }
 0x7d7   :  { %v585_v13 = vsub.f32 %v1137_v24, %v579_v9  ;;  %v602_v21 = vsel %vm159_vm1, %v591_v16, 0.0 }
 0x7d9   :  { %v589_v18 = vand.u32 2147483647, %v585_v13 }
 0x7db   :  { %v593_v23 = vsel %vm159_vm1, %v589_v18, 0.0 }
 0x83e   :  { %v615_v0 = vpop.permute.xlu0 %614 }
 0x83f   :  { %v616_v55 = vsel %vm178_vm0, %v615_v0, %v547_v57  ;;  %v653_v57 = vrot.slane %v638_v50, %v1111_v2 }
 0x840   :  { %618 = vrot.lane.b32.xlu1 %v616_v55, %s1002_s4 }
 0x842   :  { %v574_v56 = vpop.permute.xlu0 %573 }
 0x843   :  { %v578_v4 = vmul.f32 %v1127_v14, %v574_v56 }
 0x845   :  { %v582_v5 = vadd.f32 %v1131_v19, %v578_v4 }
 0x846   :  { %v563_v58 = vpop.permute.xlu0 %562 }
 0x847   :  { %v576_v62 = vmul.f32 %v1127_v14, %v563_v58  ;;  %v588_v10 = vsub.f32 %v1139_v25, %v582_v5 }
 0x849   :  { %v580_v8 = vadd.f32 %v1131_v19, %v576_v62  ;;  %v592_v15 = vand.u32 2147483647, %v588_v10 }
 0x84b   :  { %v586_v12 = vsub.f32 %v1139_v25, %v580_v8  ;;  %v603_v20 = vsel %vm159_vm1, %v592_v15, 0.0 }
 0x84c   :  { %v604_v26 = vadd.f32 %v603_v20, %v602_v21 }
 0x84d   :  { %v590_v17 = vand.u32 2147483647, %v586_v12 }
 0x84e   :  { %v605_v28 = vrot.slane %v604_v26, 4 }
 0x84f   :  { %v594_v22 = vsel %vm159_vm1, %v590_v17, 0.0 }
 0x850   :  { %v595_v27 = vadd.f32 %v594_v22, %v593_v23  ;;  %v606_v30 = vadd.f32 %v605_v28, %v604_v26 }
 0x852   :  { %v596_v29 = vrot.slane %v595_v27, 4  ;;  %v607_v32 = vrot.slane %v606_v30, 2 }
 0x854   :  { %v597_v31 = vadd.f32 %v596_v29, %v595_v27  ;;  %v608_v34 = vadd.f32 %v607_v32, %v606_v30 }
 0x856   :  { %v598_v33 = vrot.slane %v597_v31, 2  ;;  %v609_v36 = vrot.slane %v608_v34, 1 }
 0x858   :  { %v599_v35 = vadd.f32 %v598_v33, %v597_v31  ;;  %v610_v41 = vadd.f32 %v609_v36, %v608_v34 }
 0x85a   :  { %v600_v39 = vrot.slane %v599_v35, 1 }
 0x85c   :  { %v601_v44 = vadd.f32 %v600_v39, %v599_v35 }
 0x8b2   :  { %v619_v37 = vpop.permute.xlu1 %618 }
 0x8b3   :  { %v621_v38 = vsel %vm1151_vm2, inf, %v619_v37 }
 0x8b4   :  { %v623_v40 = vrot.slane %v621_v38, 1  ;;  %v626_v42 = vmin.f32 %v1282_v49, %v621_v38 }
 0x8b6   :  { %v627_v43 = vmin.f32 %v543_v48, %v623_v40  ;;  %v1313_v46 = vadd.f32 %v626_v42, %v601_v44 }
 0x8b8   :  { %v629_v45 = vadd.f32 %v627_v43, %v610_v41 }
 0x8ba   :  { %v632_v47 = vrot.slane %v629_v45, 7 }
 0x8bc   :  { %v633_v54 = vsel %vm202_vm3, %v632_v47, %v1313_v46  ;;  %v724_v47 = vld [vmem:[#allocation4 + $0xe] sm:$0x3] }
 0x8bd   :  { %697 = vrot.lane.b32.xlu0 %v633_v54, %s1001_s21  ;;  %636 = vst.msk [vmem:[#allocation12 + $0xa] sm:$0x3] %vm205_vm4, %v633_v54 }
 0x8c1   :  { %655 = vbcast.lane.b32.xlu0 %v653_v57, 256 }
 0x8c5   :  { %644 = vbcast.lane.b32.xlu0 %v642_v60, 256 }
 0x92f   :  { %v698_v48 = vpop.permute.xlu0 %697 }
 0x930   :  { %v699_v49 = vsel %vm178_vm0, %v698_v48, %v633_v54 }
 0x931   :  { %700 = vrot.lane.b32.xlu1 %v699_v49, %s1001_s21 }
 0x933   :  { %v656_v0 = vpop.permute.xlu0 %655 }
 0x934   :  { %v663_v58 = vmul.f32 %v1127_v14, %v656_v0 }
 0x935   :  { %659 = vbcast.lane.b32.xlu1 %v653_v57, 264  ;;  %v728_v57 = vrot.slane %v724_v47, %v1118_v6 }
 0x936   :  { %v667_v62 = vadd.f32 %v1131_v19, %v663_v58 }
 0x937   :  { %v645_v56 = vpop.permute.xlu0 %644 }
 0x938   :  { %v661_v4 = vmul.f32 %v1127_v14, %v645_v56  ;;  %v673_v8 = vsub.f32 %v1137_v24, %v667_v62 }
 0x939   :  { %648 = vbcast.lane.b32.xlu1 %v642_v60, 264 }
 0x93a   :  { %v665_v5 = vadd.f32 %v1131_v19, %v661_v4  ;;  %v677_v12 = vand.u32 2147483647, %v673_v8 }
 0x93c   :  { %v671_v10 = vsub.f32 %v1137_v24, %v665_v5  ;;  %v688_v17 = vsel %vm159_vm1, %v677_v12, 0.0 }
 0x93e   :  { %v675_v15 = vand.u32 2147483647, %v671_v10 }
 0x940   :  { %v679_v20 = vsel %vm159_vm1, %v675_v15, 0.0 }
 0x9a3   :  { %v701_v63 = vpop.permute.xlu1 %700 }
 0x9a4   :  { %v702_v52 = vsel %vm178_vm0, %v701_v63, %v633_v54  ;;  %v739_v54 = vrot.slane %v724_v47, %v1111_v2 }
 0x9a5   :  { %704 = vrot.lane.b32.xlu0 %v702_v52, %s1002_s4 }
 0x9a7   :  { %v660_v53 = vpop.permute.xlu1 %659 }
 0x9a8   :  { %v664_v1 = vmul.f32 %v1127_v14, %v660_v53 }
 0x9aa   :  { %v668_v61 = vadd.f32 %v1131_v19, %v664_v1 }
 0x9ab   :  { %v649_v55 = vpop.permute.xlu1 %648 }
 0x9ac   :  { %v662_v59 = vmul.f32 %v1127_v14, %v649_v55  ;;  %v674_v7 = vsub.f32 %v1139_v25, %v668_v61 }
 0x9ae   :  { %v666_v3 = vadd.f32 %v1131_v19, %v662_v59  ;;  %v678_v11 = vand.u32 2147483647, %v674_v7 }
 0x9b0   :  { %v672_v9 = vsub.f32 %v1139_v25, %v666_v3  ;;  %v689_v16 = vsel %vm159_vm1, %v678_v11, 0.0 }
 0x9b1   :  { %v690_v21 = vadd.f32 %v689_v16, %v688_v17 }
 0x9b2   :  { %v676_v13 = vand.u32 2147483647, %v672_v9 }
 0x9b3   :  { %v691_v23 = vrot.slane %v690_v21, 4 }
 0x9b4   :  { %v680_v18 = vsel %vm159_vm1, %v676_v13, 0.0 }
 0x9b5   :  { %v681_v22 = vadd.f32 %v680_v18, %v679_v20  ;;  %v692_v27 = vadd.f32 %v691_v23, %v690_v21 }
 0x9b7   :  { %v682_v26 = vrot.slane %v681_v22, 4  ;;  %v693_v29 = vrot.slane %v692_v27, 2 }
 0x9b9   :  { %v683_v28 = vadd.f32 %v682_v26, %v681_v22  ;;  %v694_v31 = vadd.f32 %v693_v29, %v692_v27 }
 0x9bb   :  { %v684_v30 = vrot.slane %v683_v28, 2  ;;  %v695_v33 = vrot.slane %v694_v31, 1 }
 0x9bd   :  { %v685_v32 = vadd.f32 %v684_v30, %v683_v28  ;;  %v696_v38 = vadd.f32 %v695_v33, %v694_v31 }
 0x9bf   :  { %v686_v36 = vrot.slane %v685_v32, 1 }
 0x9c1   :  { %v687_v41 = vadd.f32 %v686_v36, %v685_v32 }
 0xa17   :  { %v705_v34 = vpop.permute.xlu0 %704 }
 0xa18   :  { %v707_v35 = vsel %vm1151_vm2, inf, %v705_v34 }
 0xa19   :  { %v709_v37 = vrot.slane %v707_v35, 1  ;;  %v712_v39 = vmin.f32 %v1313_v46, %v707_v35 }
 0xa1b   :  { %v713_v40 = vmin.f32 %v629_v45, %v709_v37  ;;  %v1344_v43 = vadd.f32 %v712_v39, %v687_v41 }
 0xa1d   :  { %v715_v42 = vadd.f32 %v713_v40, %v696_v38 }
 0xa1f   :  { %v718_v44 = vrot.slane %v715_v42, 7 }
 0xa21   :  { %v719_v50 = vsel %vm202_vm3, %v718_v44, %v1344_v43 }
 0xa22   :  { %783 = vrot.lane.b32.xlu1 %v719_v50, %s1001_s21  ;;  %722 = vst.msk [vmem:[#allocation12 + $0xc] sm:$0x3] %vm205_vm4, %v719_v50 }
 0xa26   :  { %741 = vbcast.lane.b32.xlu1 %v739_v54, 256 }
 0xa2a   :  { %730 = vbcast.lane.b32.xlu1 %v728_v57, 256 }
 0xa94   :  { %v784_v45 = vpop.permute.xlu1 %783 }
 0xa95   :  { %v785_v46 = vsel %vm178_vm0, %v784_v45, %v719_v50 }
 0xa96   :  { %786 = vrot.lane.b32.xlu0 %v785_v46, %s1001_s21 }
 0xa98   :  { %v742_v63 = vpop.permute.xlu1 %741 }
 0xa99   :  { %v749_v6 = vmul.f32 %v1127_v14, %v742_v63 }
 0xa9a   :  { %745 = vbcast.lane.b32.xlu0 %v739_v54, 264 }
 0xa9b   :  { %v753_v1 = vadd.f32 %v1131_v19, %v749_v6 }
 0xa9c   :  { %v731_v2 = vpop.permute.xlu1 %730 }
 0xa9d   :  { %v747_v55 = vmul.f32 %v1127_v14, %v731_v2  ;;  %v759_v61 = vsub.f32 %v1137_v24, %v753_v1 }
 0xa9e   :  { %734 = vbcast.lane.b32.xlu0 %v728_v57, 264 }
 0xa9f   :  { %v751_v59 = vadd.f32 %v1131_v19, %v747_v55  ;;  %v763_v7 = vand.u32 2147483647, %v759_v61 }
 0xaa1   :  { %v757_v3 = vsub.f32 %v1137_v24, %v751_v59  ;;  %v774_v10 = vsel %vm159_vm1, %v763_v7, 0.0 }
 0xb08   :  { %v787_v60 = vpop.permute.xlu0 %786 }
 0xb09   :  { %v788_v48 = vsel %vm178_vm0, %v787_v60, %v719_v50 }
 0xb0a   :  { %790 = vrot.lane.b32.xlu1 %v788_v48, %s1002_s4 }
 0xb0c   :  { %v746_v49 = vpop.permute.xlu0 %745 }
 0xb0d   :  { %v750_v53 = vmul.f32 %v1127_v14, %v746_v49 }
 0xb0f   :  { %v754_v56 = vadd.f32 %v1131_v19, %v750_v53 }
 0xb10   :  { %v735_v52 = vpop.permute.xlu0 %734 }
 0xb11   :  { %v748_v0 = vmul.f32 %v1127_v14, %v735_v52  ;;  %v760_v4 = vsub.f32 %v1139_v25, %v754_v56  ;;  %v761_v14 = vand.u32 2147483647, %v757_v3 }
 0xb13   :  { %v752_v58 = vadd.f32 %v1131_v19, %v748_v0  ;;  %v764_v5 = vand.u32 2147483647, %v760_v4  ;;  %v765_v19 = vsel %vm159_vm1, %v761_v14, 0.0 }
 0xb15   :  { %v758_v62 = vsub.f32 %v1139_v25, %v752_v58  ;;  %v775_v9 = vsel %vm159_vm1, %v764_v5, 0.0 }
 0xb16   :  { %v776_v12 = vadd.f32 %v775_v9, %v774_v10 }
 0xb17   :  { %v762_v8 = vand.u32 2147483647, %v758_v62 }
 0xb18   :  { %v777_v15 = vrot.slane %v776_v12, 4 }
 0xb19   :  { %v766_v11 = vsel %vm159_vm1, %v762_v8, 0.0 }
 0xb1a   :  { %v767_v13 = vadd.f32 %v766_v11, %v765_v19  ;;  %v778_v17 = vadd.f32 %v777_v15, %v776_v12 }
 0xb1c   :  { %v768_v16 = vrot.slane %v767_v13, 4  ;;  %v779_v18 = vrot.slane %v778_v17, 2 }
 0xb1e   :  { %v769_v25 = vadd.f32 %v768_v16, %v767_v13  ;;  %v780_v20 = vadd.f32 %v779_v18, %v778_v17 }
 0xb20   :  { %v770_v24 = vrot.slane %v769_v25, 2  ;;  %v781_v22 = vrot.slane %v780_v20, 1 }
 0xb22   :  { %v771_v21 = vadd.f32 %v770_v24, %v769_v25  ;;  %v782_v29 = vadd.f32 %v781_v22, %v780_v20 }
 0xb24   :  { %v772_v27 = vrot.slane %v771_v21, 1 }
 0xb26   :  { %v773_v32 = vadd.f32 %v772_v27, %v771_v21 }
 0xb7c   :  { %v791_v23 = vpop.permute.xlu1 %790 }
 0xb7d   :  { %v793_v26 = vsel %vm1151_vm2, inf, %v791_v23 }
 0xb7e   :  { %v795_v28 = vrot.slane %v793_v26, 1  ;;  %v798_v30 = vmin.f32 %v1344_v43, %v793_v26 }
 0xb80   :  { %v799_v31 = vmin.f32 %v715_v42, %v795_v28  ;;  %v800_v34 = vadd.f32 %v798_v30, %v773_v32 }
 0xb82   :  { %v801_v33 = vadd.f32 %v799_v31, %v782_v29 }
 0xb84   :  { %v804_v35 = vrot.slane %v801_v33, 7 }
 0xb86   :  { %v805_v36 = vsel %vm202_vm3, %v804_v35, %v800_v34 }
 0xb87   :  { %808 = vst.msk [vmem:[#allocation12 + $0xe] sm:$0x3] %vm205_vm4, %v805_v36  ;;  %809 = vst.msk [vmem:[#allocation2] sm:$0x3] %vm205_vm4, %v805_v36 }
 0xb88   :  { %971 = shalt.err (!%p968_p2)
}
 0xb89   :  { %s972_s11 = scalar_lea.hbm %s1398_s5, 256 }
 0xb8a   :  { %p973_p3 = scmp.ne.s32.totalorder %s1398_s5, %s972_s11  ;;  %p976_p4 = scmp.lt.u32.totalorder %s972_s11, %s1398_s5 }
 0xb8c   :  { %p978_p5 = pnand %p976_p4, %p973_p3 }
 0xb8e   :  { %981 = shalt.err (!%p978_p5)
}
 0xb8f   :  { %821 = dma.vmem_to_hbm [thread:$0]  %s816_s7, 256, %s1398_s5, [#allocation6], %s994_s1, %s994_s1, %s995_s16  }
 0xb90   :  { %990 = dma.done.wait [#allocation6], 256  }
 0xb91   :  { %991 = vsyncadd [#allocation6], 4294967040 }
 0xb92   :  { %825 = vsyncpa [#allocation5], 1 }
 0xb93   :  { %826 = vsyncpa [#allocation8], 1 }
 0xb94   :  { %827 = vsyncpa [#allocation11], 1 }
 0xb95   :  { %828 = vsyncpa [#allocation6], 1 }
 0xb96   :  { %829 = vsyncmov [#allocation3] }
 0xb99   :  { %s830_s18 = vpop.sfrf %829 }
 0xb9a   :  { %p837_p6 = scmp.ne.s32.totalorder %s830_s18, 0 }
 0xb9c   :  { %834 = shalt.err (%p837_p6)  }

</bundles_post_ra>
